<compile_context>
chip_gen: v7x
topology: tpu7x:2x2x1
jax: 0.10.0
libtpu: 0.0.40
codegen_flags: <defaults>
</compile_context>

<pallas_src>
import functools

import jax
import jax.numpy as jnp
from jax.experimental import pallas as pl
from jax.experimental.pallas import tpu as pltpu

_IN_EPS = 1e-5    # nn.InstanceNorm1d default eps
_L2_EPS = 1e-12   # F.normalize default eps

_G = 16           # original rows packed per lane-dense row (16 * 8 = 128 lanes)
_C_OUT = 8        # 7 conv channels + 1 zero-pad column that becomes the ones-column


def _round_up(a, b):
    return (a + b - 1) // b * b


def _pick_tile(n, max_tile=2048):
    if n >= max_tile:
        return max_tile
    return max(8, _round_up(n, 8))


def _lane_sum_mod8(v):
    """Sum the 16 lanes sharing the same (lane mod 8) residue; result replicated.

    Circular lane rolls by 8/16/32/64 cover all 16 members of each residue
    class regardless of the roll sign convention; all adds are exact f32.
    """
    for sh in (8, 16, 32, 64):
        v = v + pltpu.roll(v, shift=sh, axis=1)
    return v


# ---------------------------------------------------------------------------
# Fused kernel: Conv1d(72,7,bias=False) + InstanceNorm1d(7) + ReLU + cat(ones)
#               + row-wise L2 normalize, lane-dense packed layout.
#
#   xg_ref  : (rpt, 1152)   16-row-grouped feature tile (16*72 lanes, dense)
#   w_ref   : (1152, 128)   kron(I16, [W^T | 0]) in bf16 (block-diagonal)
#   sseg_ref: (128, 128)    block-diag ones(8,8): segmented-sum matrix
#   o_ref   : (U*rpt, 128)  packed output block (lane-dense)
#   y_ref   : (nt, rpt, 128) resident packed y cache   (exactly 32 B / point)
#   csum/cssq : (1, 128)    per-lane sum / sumsq -> overwritten with mean/istd
# ---------------------------------------------------------------------------
def _saob_fused_kernel(xg_ref, w_ref, sseg_ref, o_ref,
                       y_ref, csum_ref, cssq_ref,
                       *, nt, u_tiles, rpt, n_valid):
    s = pl.program_id(0)

    @pl.when(s == 0)
    def _init():
        csum_ref[...] = jnp.zeros_like(csum_ref)
        cssq_ref[...] = jnp.zeros_like(cssq_ref)

    # ---- pass 0: matmul + stat accumulation + cache (steps [0, nt)) --------
    @pl.when(s < nt)
    def _pass0():
        xg = xg_ref[...].astype(jnp.bfloat16)                       # MXU operands
        yp = jnp.dot(xg, w_ref[...], preferred_element_type=jnp.float32)  # (rpt,128)
        # Padded rows are zero, so they contribute exactly 0 here (no masking).
        csum_ref[...] += jnp.sum(yp, axis=0, keepdims=True)
        cssq_ref[...] += jnp.sum(yp * yp, axis=0, keepdims=True)
        y_ref[s] = yp                                               # resident cache

    # ---- finalize stats once (first pass-1 step) ---------------------------
    @pl.when(s == nt)
    def _finalize():
        tot = _lane_sum_mod8(csum_ref[...])                         # exact f32
        tot2 = _lane_sum_mod8(cssq_ref[...])
        inv_n = 1.0 / float(n_valid)
        mean = tot * inv_n
        var = jnp.maximum(tot2 * inv_n - mean * mean, 0.0)
        csum_ref[...] = mean                                        # reuse scratches
        cssq_ref[...] = jax.lax.rsqrt(var + _IN_EPS)                # EUP

    # ---- pass 1: apply IN + ReLU + ones + row L2 for U cached tiles --------
    @pl.when(s >= nt)
    def _pass1():
        mean = csum_ref[...]
        istd = cssq_ref[...]
        sseg = sseg_ref[...]
        lane = jax.lax.broadcasted_iota(jnp.int32, (rpt, 128), 1)   # hoisted
        ones_lane = (lane & 7) == 7         # zero-pad channel -> appended ones
        t = s - nt
        for u in range(u_tiles):            # static unroll: static store offsets
            yp = y_ref[t * u_tiles + u]                              # (rpt, 128)
            z = jnp.maximum((yp - mean) * istd, 0.0)                 # IN + ReLU
            z = jnp.where(ones_lane, 1.0, z)                         # cat(ones)
            # Per-point squared norm = segmented 8-lane sum, done as a tiny
            # matmul with the block-diagonal ones matrix (MXU idle in pass 1).
            nsq = jnp.dot(z * z, sseg, preferred_element_type=jnp.float32)
            z = z * jax.lax.rsqrt(jnp.maximum(nsq, _L2_EPS * _L2_EPS))
            o_ref[pl.ds(u * rpt, rpt), :] = z.astype(o_ref.dtype)


def saob_first_layer_l2(x, w_block, *, tile=None, max_tile=2048):
    """Fused first_layer + cat(ones) + F.normalize for the use_B branch."""
    n, c_in = x.shape
    assert w_block.shape == (_G * c_in, _G * _C_OUT), w_block.shape

    req = max(16, int(tile) if tile is not None else max_tile)
    if n <= req:
        tile_rows = _round_up(n, _G)                 # single tile covers everything
    else:
        tile_rows = max(128, (req // 128) * 128)     # keeps rpt a multiple of 8
    n_pad = _round_up(n, tile_rows)
    if n_pad != n:
        x = jnp.pad(x, ((0, n_pad - n), (0, 0)))

    nt = n_pad // tile_rows
    rpt = tile_rows // _G                            # packed rows per tile
    u_tiles = 8
    while nt % u_tiles:
        u_tiles //= 2
    n_apply = nt // u_tiles

    # Free, layout-preserving view: (n_pad, 72) -> (n_pad/16, 1152).
    xg = x.reshape(n_pad // _G, _G * c_in)

    # Segmented-sum matrix: block-diagonal ones(8,8), built once (64 KiB).
    lane = jnp.arange(_G * _C_OUT, dtype=jnp.int32)
    s_seg = (lane[:, None] // _C_OUT == lane[None, :] // _C_OUT).astype(jnp.float32)

    # Explicit VMEM budget (review item): packed cache + double-buffered I/O.
    cache_bytes = nt * rpt * 128 * 4
    io_bytes = (2 * rpt * _G * c_in * x.dtype.itemsize
                + 2 * int(w_block.size) * w_block.dtype.itemsize
                + 2 * int(s_seg.size) * 4
                + 2 * u_tiles * rpt * 128 * x.dtype.itemsize
                + 4 * 128 * 4)
    vmem_limit = int(min(max(cache_bytes + io_bytes + (4 << 20), 32 << 20), 127 << 20))
    # TODO(synk): for v7x (64 MiB physical VMEM) and N beyond ~1.5M points,
    # spill the packed y cache to HBM via input_output_aliases instead.

    kernel = functools.partial(_saob_fused_kernel, nt=nt, u_tiles=u_tiles,
                               rpt=rpt, n_valid=n)
    out = pl.pallas_call(
        kernel,
        out_shape=jax.ShapeDtypeStruct((n_pad // _G, _G * _C_OUT), x.dtype),
        grid=(nt + n_apply,),
        in_specs=[
            # x blocks advance only during pass 0; the clamp keeps the block
            # index constant once pass 1 starts, so no dead DMA at the switch.
            pl.BlockSpec((rpt, _G * c_in), lambda s: (jnp.minimum(s, nt - 1), 0)),
            pl.BlockSpec((_G * c_in, _G * _C_OUT), lambda s: (0, 0)),
            pl.BlockSpec((_G * _C_OUT, _G * _C_OUT), lambda s: (0, 0)),
        ],
        # Lane-dense output blocks; they only advance during pass 1.
        out_specs=pl.BlockSpec((u_tiles * rpt, _G * _C_OUT),
                               lambda s: (jnp.maximum(s - nt, 0), 0)),
        scratch_shapes=[
            pltpu.VMEM((nt, rpt, _G * _C_OUT), jnp.float32),  # packed y cache (32 B/pt)
            pltpu.VMEM((1, _G * _C_OUT), jnp.float32),        # per-lane sum  -> mean
            pltpu.VMEM((1, _G * _C_OUT), jnp.float32),        # per-lane ssq  -> inv_std
        ],
        compiler_params=pltpu.CompilerParams(
            # Cross-tile stats + resident cache => sequential on one TensorCore.
            # TODO(synk): two-TC split for v7x (per-core partials + shared reduce).
            dimension_semantics=("arbitrary",),
            vmem_limit_bytes=vmem_limit),
    )(xg, w_block, s_seg)

    out = out.reshape(n_pad, _C_OUT)     # free: identical row-major linear layout
    return out[:n] if n_pad != n else out


# ---------------------------------------------------------------------------
# Standalone row-wise L2 normalize (use_B=False path), row-tiled + parallel.
# ---------------------------------------------------------------------------
def _l2_normalize_kernel(x_ref, o_ref):
    x = x_ref[...].astype(jnp.float32)
    ssq = jnp.sum(x * x, axis=1, keepdims=True)
    inv = jax.lax.rsqrt(jnp.maximum(ssq, _L2_EPS * _L2_EPS))
    o_ref[...] = (x * inv).astype(o_ref.dtype)


def l2_normalize(x, *, tile=None):
    n, c = x.shape
    tile = tile or _pick_tile(n)
    tile = max(8, _round_up(min(tile, _round_up(n, 8)), 8))
    n_pad = _round_up(n, tile)
    if n_pad != n:
        x = jnp.pad(x, ((0, n_pad - n), (0, 0)))
    out = pl.pallas_call(
        _l2_normalize_kernel,
        out_shape=jax.ShapeDtypeStruct((n_pad, c), x.dtype),
        grid=(n_pad // tile,),
        in_specs=[pl.BlockSpec((tile, c), lambda i: (i, 0))],
        out_specs=pl.BlockSpec((tile, c), lambda i: (i, 0)),
        compiler_params=pltpu.CompilerParams(
            dimension_semantics=("parallel",)),   # row-independent: megacore OK
    )(x)
    return out[:n] if n_pad != n else out


# ---------------------------------------------------------------------------
# Module wrapper
# ---------------------------------------------------------------------------
class SAOBPallas:
    """JAX/Pallas counterpart of SAOB.forward (use_B branch + final normalize)."""

    def __init__(self, use_B=True, key=jax.random.PRNGKey(0), tile=None):
        self.use_B = use_B
        self.tile = tile
        self.epsilon = jnp.float32(-5.0)  # parameter from __init__ (unused in fwd)
        if use_B:
            # Conv1d(72, 7, kernel_size=1, bias=False) weight: (out=7, in=72).
            fan_in = 72.0
            bound = 1.0 / jnp.sqrt(fan_in)
            self.w = jax.random.uniform(key, (7, 72), jnp.float32, -bound, bound)
            # [W^T | 0] -> block-diagonal kron(I16, .) so the MXU emits the
            # lane-dense packed layout directly.  Stored bf16 (MXU-native).
            wt = jnp.concatenate([self.w.T, jnp.zeros((72, 1), jnp.float32)], axis=1)
            self.w_block = jnp.kron(jnp.eye(_G, dtype=jnp.float32),
                                    wt).astype(jnp.bfloat16)

    def __call__(self, batch):
        x = batch["features"]
        if self.use_B:
            x = saob_first_layer_l2(x, self.w_block, tile=self.tile)
            # TODO(synk): encoder_blocks / decoder_blocks (block_decider / KPConv
            # over neighbor & pooling indices) are external and undefined here;
            # identity pass-through.  L2 normalize is already fused above.
            return x
        # TODO(synk): encoder_blocks / decoder_blocks identity pass-through.
        return l2_normalize(x, tile=self.tile)


# ---------------------------------------------------------------------------
# Pure-JAX reference of the implemented path (for correctness check).
# ---------------------------------------------------------------------------
def _reference(x, w):
    y = x @ w.T                                               # (N, 7)
    mean = jnp.mean(y, axis=0, keepdims=True)
    var = jnp.mean((y - mean) ** 2, axis=0, keepdims=True)
    y = (y - mean) / jnp.sqrt(var + _IN_EPS)
    y = jnp.maximum(y, 0.0)
    y = jnp.concatenate([y, jnp.ones((x.shape[0], 1), x.dtype)], axis=1)
    nrm = jnp.maximum(jnp.linalg.norm(y, axis=1, keepdims=True), _L2_EPS)
    return y / nrm


if __name__ == "__main__":
    key = jax.random.PRNGKey(0)
    k_feat, k_pts, k_w = jax.random.split(key, 3)

    N = 1024         # total points (src + tgt), fine level
    C_IN = 72        # required by the use_B Conv1d(72, 7, ...)

    features = jax.random.normal(k_feat, (N, C_IN), jnp.float32)
    points_f = jax.random.normal(k_pts, (N, 3), jnp.float32)
    batch = {
        "features": features,
        "points": [points_f, points_f[::4]],
        "stack_lengths": [jnp.array([N // 2, N // 2], jnp.int32),
                          jnp.array([N // 8, N // 8], jnp.int32)],
    }

    # Multi-tile path: tile=128 -> nt=8 matmul tiles, U=8 apply-chunks per step.
    model = SAOBPallas(use_B=True, key=k_w, tile=128)
    feats_a = jax.block_until_ready(model(batch))
    assert feats_a.shape == (N, 8), feats_a.shape

    ref = _reference(features, model.w)
    err_a = float(jnp.max(jnp.abs(feats_a - ref)))
    assert err_a < 2e-2, err_a
    row_norms = jnp.linalg.norm(feats_a, axis=1)
    assert bool(jnp.all(jnp.abs(row_norms - 1.0) < 5e-3))

    # Single-tile (default-tile) path, same weights.
    model_b = SAOBPallas(use_B=True, key=k_w)
    feats_b = jax.block_until_ready(model_b(batch))
    err_b = float(jnp.max(jnp.abs(feats_b - ref)))
    assert err_b < 2e-2, err_b

    # use_B = False path: plain row-wise L2 normalize.
    plain = jax.block_until_ready(SAOBPallas(use_B=False)(batch))
    assert plain.shape == (N, C_IN)
    ref_plain = features / jnp.maximum(
        jnp.linalg.norm(features, axis=1, keepdims=True), _L2_EPS)
    assert float(jnp.max(jnp.abs(plain - ref_plain))) < 1e-5

    print("KERNEL_OK")
</pallas_src>

<mosaic_0001>
module attributes {stable_mosaic.version = 11 : i64} {
  func.func @_saob_fused_kernel(%arg0: i32, %arg1: memref<8x1152xf32, #tpu.memory_space<vmem>>, %arg2: memref<1152x128xbf16, #tpu.memory_space<vmem>>, %arg3: memref<128x128xf32, #tpu.memory_space<vmem>>, %arg4: memref<64x128xf32, #tpu.memory_space<vmem>>, %arg5: memref<8x8x128xf32, #tpu.memory_space<vmem>>, %arg6: memref<1x128xf32, #tpu.memory_space<vmem>>, %arg7: memref<1x128xf32, #tpu.memory_space<vmem>>) attributes {dimension_semantics = [#tpu.dimension_semantics<arbitrary>], iteration_bounds = array<i64: 9>, scalar_prefetch = 0 : i64, scratch_operands = 3 : i64, tpu.core_type = #tpu.core_type<tc>, window_params = [{transform_indices = @transform_0, window_bounds = array<i64: 8, 1152>}, {pipeline_mode = #tpu.pipeline_mode<synchronous>, transform_indices = @transform_1, window_bounds = array<i64: 1152, 128>}, {pipeline_mode = #tpu.pipeline_mode<synchronous>, transform_indices = @transform_2, window_bounds = array<i64: 128, 128>}, {transform_indices = @transform_3, window_bounds = array<i64: 64, 128>}]} {
    %c0_i32 = arith.constant 0 : i32
    %0 = arith.cmpi eq, %arg0, %c0_i32 : i32
    %1 = arith.extui %0 : i1 to i32
    %c0_i32_0 = arith.constant 0 : i32
    %2 = arith.cmpi ne, %1, %c0_i32_0 : i32
    scf.if %2 {
      %cst = arith.constant 0.000000e+00 : f32
      %12 = vector.broadcast %cst : f32 to vector<1x128xf32>
      %c0 = arith.constant 0 : index
      %c0_6 = arith.constant 0 : index
      %13 = vector.load %arg6[%c0, %c0_6] : memref<1x128xf32, #tpu.memory_space<vmem>>, vector<1x128xf32>
      tpu.vector_store %arg6[%c0, %c0_6], %12 {strides = array<i32>} : memref<1x128xf32, #tpu.memory_space<vmem>>, vector<1x128xf32>,
      %cst_7 = arith.constant 0.000000e+00 : f32
      %14 = vector.broadcast %cst_7 : f32 to vector<1x128xf32>
      %c0_8 = arith.constant 0 : index
      %c0_9 = arith.constant 0 : index
      %15 = vector.load %arg7[%c0_8, %c0_9] : memref<1x128xf32, #tpu.memory_space<vmem>>, vector<1x128xf32>
      tpu.vector_store %arg7[%c0_8, %c0_9], %14 {strides = array<i32>} : memref<1x128xf32, #tpu.memory_space<vmem>>, vector<1x128xf32>,
    } else {
    }
    %c8_i32 = arith.constant 8 : i32
    %3 = arith.cmpi slt, %arg0, %c8_i32 : i32
    %4 = arith.extui %3 : i1 to i32
    %c0_i32_1 = arith.constant 0 : i32
    %5 = arith.cmpi ne, %4, %c0_i32_1 : i32
    scf.if %5 {
      %c0 = arith.constant 0 : index
      %c0_6 = arith.constant 0 : index
      %12 = vector.load %arg1[%c0, %c0_6] : memref<8x1152xf32, #tpu.memory_space<vmem>>, vector<8x1152xf32>
      %13 = arith.truncf %12 : vector<8x1152xf32> to vector<8x1152xbf16>
      %c0_7 = arith.constant 0 : index
      %c0_8 = arith.constant 0 : index
      %14 = vector.load %arg2[%c0_7, %c0_8] : memref<1152x128xbf16, #tpu.memory_space<vmem>>, vector<1152x128xbf16>
      %cst = arith.constant dense<0.000000e+00> : vector<8x128xf32>
      %15 = tpu.matmul %13, %14, %cst {dimension_numbers = #tpu.dot_dimension_numbers<[1], [0], [0], [1], [0, 0, 1, 1], [], []>} : vector<8x1152xbf16>, vector<1152x128xbf16>, vector<8x128xf32> -> vector<8x128xf32>
      %c0_9 = arith.constant 0 : index
      %c0_10 = arith.constant 0 : index
      %16 = vector.load %arg6[%c0_9, %c0_10] : memref<1x128xf32, #tpu.memory_space<vmem>>, vector<1x128xf32>
      %cst_11 = arith.constant dense<0.000000e+00> : vector<128xf32>
      %17 = vector.multi_reduction <add>, %15, %cst_11 [0] : vector<8x128xf32> to vector<128xf32>
      %18 = vector.shape_cast %17 : vector<128xf32> to vector<1x128xf32>
      %19 = arith.addf %16, %18 : vector<1x128xf32>
      %c0_12 = arith.constant 0 : index
      %c0_13 = arith.constant 0 : index
      %20 = vector.load %arg6[%c0_12, %c0_13] : memref<1x128xf32, #tpu.memory_space<vmem>>, vector<1x128xf32>
      tpu.vector_store %arg6[%c0_12, %c0_13], %19 {strides = array<i32>} : memref<1x128xf32, #tpu.memory_space<vmem>>, vector<1x128xf32>,
      %c0_14 = arith.constant 0 : index
      %c0_15 = arith.constant 0 : index
      %21 = vector.load %arg7[%c0_14, %c0_15] : memref<1x128xf32, #tpu.memory_space<vmem>>, vector<1x128xf32>
      %22 = arith.mulf %15, %15 : vector<8x128xf32>
      %cst_16 = arith.constant dense<0.000000e+00> : vector<128xf32>
      %23 = vector.multi_reduction <add>, %22, %cst_16 [0] : vector<8x128xf32> to vector<128xf32>
      %24 = vector.shape_cast %23 : vector<128xf32> to vector<1x128xf32>
      %25 = arith.addf %21, %24 : vector<1x128xf32>
      %c0_17 = arith.constant 0 : index
      %c0_18 = arith.constant 0 : index
      %26 = vector.load %arg7[%c0_17, %c0_18] : memref<1x128xf32, #tpu.memory_space<vmem>>, vector<1x128xf32>
      tpu.vector_store %arg7[%c0_17, %c0_18], %25 {strides = array<i32>} : memref<1x128xf32, #tpu.memory_space<vmem>>, vector<1x128xf32>,
      %27 = arith.index_cast %arg0 : i32 to index
      %c0_19 = arith.constant 0 : index
      %c0_20 = arith.constant 0 : index
      %28 = vector.load %arg5[%27, %c0_19, %c0_20] : memref<8x8x128xf32, #tpu.memory_space<vmem>>, vector<1x8x128xf32>
      %29 = vector.shape_cast %28 : vector<1x8x128xf32> to vector<8x128xf32>
      %30 = vector.shape_cast %15 : vector<8x128xf32> to vector<1x8x128xf32>
      tpu.vector_store %arg5[%27, %c0_19, %c0_20], %30 {strides = array<i32>} : memref<8x8x128xf32, #tpu.memory_space<vmem>>, vector<1x8x128xf32>,
    } else {
    }
    %c8_i32_2 = arith.constant 8 : i32
    %6 = arith.cmpi eq, %arg0, %c8_i32_2 : i32
    %7 = arith.extui %6 : i1 to i32
    %c0_i32_3 = arith.constant 0 : i32
    %8 = arith.cmpi ne, %7, %c0_i32_3 : i32
    scf.if %8 {
      %c0 = arith.constant 0 : index
      %c0_6 = arith.constant 0 : index
      %12 = vector.load %arg6[%c0, %c0_6] : memref<1x128xf32, #tpu.memory_space<vmem>>, vector<1x128xf32>
      %c8_i32_7 = arith.constant 8 : i32
      %13 = tpu.dynamic_rotate %12 by %c8_i32_7 dim 1 : vector<1x128xf32>, i32 -> vector<1x128xf32>
      %14 = arith.addf %12, %13 : vector<1x128xf32>
      %c16_i32 = arith.constant 16 : i32
      %15 = tpu.dynamic_rotate %14 by %c16_i32 dim 1 : vector<1x128xf32>, i32 -> vector<1x128xf32>
      %16 = arith.addf %14, %15 : vector<1x128xf32>
      %c32_i32 = arith.constant 32 : i32
      %17 = tpu.dynamic_rotate %16 by %c32_i32 dim 1 : vector<1x128xf32>, i32 -> vector<1x128xf32>
      %18 = arith.addf %16, %17 : vector<1x128xf32>
      %c64_i32 = arith.constant 64 : i32
      %19 = tpu.dynamic_rotate %18 by %c64_i32 dim 1 : vector<1x128xf32>, i32 -> vector<1x128xf32>
      %20 = arith.addf %18, %19 : vector<1x128xf32>
      %c0_8 = arith.constant 0 : index
      %c0_9 = arith.constant 0 : index
      %21 = vector.load %arg7[%c0_8, %c0_9] : memref<1x128xf32, #tpu.memory_space<vmem>>, vector<1x128xf32>
      %c8_i32_10 = arith.constant 8 : i32
      %22 = tpu.dynamic_rotate %21 by %c8_i32_10 dim 1 : vector<1x128xf32>, i32 -> vector<1x128xf32>
      %23 = arith.addf %21, %22 : vector<1x128xf32>
      %c16_i32_11 = arith.constant 16 : i32
      %24 = tpu.dynamic_rotate %23 by %c16_i32_11 dim 1 : vector<1x128xf32>, i32 -> vector<1x128xf32>
      %25 = arith.addf %23, %24 : vector<1x128xf32>
      %c32_i32_12 = arith.constant 32 : i32
      %26 = tpu.dynamic_rotate %25 by %c32_i32_12 dim 1 : vector<1x128xf32>, i32 -> vector<1x128xf32>
      %27 = arith.addf %25, %26 : vector<1x128xf32>
      %c64_i32_13 = arith.constant 64 : i32
      %28 = tpu.dynamic_rotate %27 by %c64_i32_13 dim 1 : vector<1x128xf32>, i32 -> vector<1x128xf32>
      %29 = arith.addf %27, %28 : vector<1x128xf32>
      %cst = arith.constant 9.765625E-4 : f32
      %30 = vector.broadcast %cst : f32 to vector<1x128xf32>
      %31 = arith.mulf %20, %30 : vector<1x128xf32>
      %cst_14 = arith.constant 9.765625E-4 : f32
      %32 = vector.broadcast %cst_14 : f32 to vector<1x128xf32>
      %33 = arith.mulf %29, %32 : vector<1x128xf32>
      %34 = arith.mulf %31, %31 : vector<1x128xf32>
      %35 = arith.subf %33, %34 : vector<1x128xf32>
      %cst_15 = arith.constant 0.000000e+00 : f32
      %36 = vector.broadcast %cst_15 : f32 to vector<1x128xf32>
      %37 = arith.maximumf %35, %36 : vector<1x128xf32>
      %c0_16 = arith.constant 0 : index
      %c0_17 = arith.constant 0 : index
      %38 = vector.load %arg6[%c0_16, %c0_17] : memref<1x128xf32, #tpu.memory_space<vmem>>, vector<1x128xf32>
      tpu.vector_store %arg6[%c0_16, %c0_17], %31 {strides = array<i32>} : memref<1x128xf32, #tpu.memory_space<vmem>>, vector<1x128xf32>,
      %cst_18 = arith.constant 9.99999974E-6 : f32
      %39 = vector.broadcast %cst_18 : f32 to vector<1x128xf32>
      %40 = arith.addf %37, %39 : vector<1x128xf32>
      %41 = math.rsqrt %40 : vector<1x128xf32>
      %c0_19 = arith.constant 0 : index
      %c0_20 = arith.constant 0 : index
      %42 = vector.load %arg7[%c0_19, %c0_20] : memref<1x128xf32, #tpu.memory_space<vmem>>, vector<1x128xf32>
      tpu.vector_store %arg7[%c0_19, %c0_20], %41 {strides = array<i32>} : memref<1x128xf32, #tpu.memory_space<vmem>>, vector<1x128xf32>,
    } else {
    }
    %c8_i32_4 = arith.constant 8 : i32
    %9 = arith.cmpi sge, %arg0, %c8_i32_4 : i32
    %10 = arith.extui %9 : i1 to i32
    %c0_i32_5 = arith.constant 0 : i32
    %11 = arith.cmpi ne, %10, %c0_i32_5 : i32
    scf.if %11 {
      %c0 = arith.constant 0 : index
      %c0_6 = arith.constant 0 : index
      %12 = vector.load %arg6[%c0, %c0_6] : memref<1x128xf32, #tpu.memory_space<vmem>>, vector<1x128xf32>
      %c0_7 = arith.constant 0 : index
      %c0_8 = arith.constant 0 : index
      %13 = vector.load %arg7[%c0_7, %c0_8] : memref<1x128xf32, #tpu.memory_space<vmem>>, vector<1x128xf32>
      %c0_9 = arith.constant 0 : index
      %c0_10 = arith.constant 0 : index
      %14 = vector.load %arg3[%c0_9, %c0_10] : memref<128x128xf32, #tpu.memory_space<vmem>>, vector<128x128xf32>
      %15 = tpu.iota {dimensions = array<i32: 1>} : vector<8x128xi32>
      %c7_i32 = arith.constant 7 : i32
      %16 = vector.broadcast %c7_i32 : i32 to vector<8x128xi32>
      %17 = arith.andi %15, %16 : vector<8x128xi32>
      %c7_i32_11 = arith.constant 7 : i32
      %18 = vector.broadcast %c7_i32_11 : i32 to vector<8x128xi32>
      %19 = arith.cmpi eq, %17, %18 : vector<8x128xi32>
      %c8_i32_12 = arith.constant 8 : i32
      %20 = arith.subi %arg0, %c8_i32_12 : i32
      %c8_i32_13 = arith.constant 8 : i32
      %21 = arith.muli %20, %c8_i32_13 : i32
      %c0_i32_14 = arith.constant 0 : i32
      %22 = arith.addi %21, %c0_i32_14 : i32
      %23 = arith.index_cast %22 : i32 to index
      %c0_15 = arith.constant 0 : index
      %c0_16 = arith.constant 0 : index
      %24 = vector.load %arg5[%23, %c0_15, %c0_16] : memref<8x8x128xf32, #tpu.memory_space<vmem>>, vector<1x8x128xf32>
      %25 = vector.shape_cast %24 : vector<1x8x128xf32> to vector<8x128xf32>
      %26 = vector.broadcast %12 : vector<1x128xf32> to vector<8x128xf32>
      %27 = arith.subf %25, %26 : vector<8x128xf32>
      %28 = vector.broadcast %13 : vector<1x128xf32> to vector<8x128xf32>
      %29 = arith.mulf %27, %28 : vector<8x128xf32>
      %cst = arith.constant 0.000000e+00 : f32
      %30 = vector.broadcast %cst : f32 to vector<8x128xf32>
      %31 = arith.maximumf %29, %30 : vector<8x128xf32>
      %cst_17 = arith.constant 1.000000e+00 : f32
      %32 = vector.broadcast %cst_17 : f32 to vector<8x128xf32>
      %33 = arith.select %19, %32, %31 : vector<8x128xi1>, vector<8x128xf32>
      %34 = arith.mulf %33, %33 : vector<8x128xf32>
      %cst_18 = arith.constant dense<0.000000e+00> : vector<8x128xf32>
      %35 = tpu.matmul %34, %14, %cst_18 {dimension_numbers = #tpu.dot_dimension_numbers<[1], [0], [0], [1], [0, 0, 1, 1], [], []>} : vector<8x128xf32>, vector<128x128xf32>, vector<8x128xf32> -> vector<8x128xf32>
      %cst_19 = arith.constant 1.000000e-24 : f32
      %36 = vector.broadcast %cst_19 : f32 to vector<8x128xf32>
      %37 = arith.maximumf %35, %36 : vector<8x128xf32>
      %38 = math.rsqrt %37 : vector<8x128xf32>
      %39 = arith.mulf %33, %38 : vector<8x128xf32>
      %c0_20 = arith.constant 0 : index
      %c0_21 = arith.constant 0 : index
      %40 = vector.load %arg4[%c0_20, %c0_21] : memref<64x128xf32, #tpu.memory_space<vmem>>, vector<8x128xf32>
      tpu.vector_store %arg4[%c0_20, %c0_21], %39 {strides = array<i32>} : memref<64x128xf32, #tpu.memory_space<vmem>>, vector<8x128xf32>,
      %c8_i32_22 = arith.constant 8 : i32
      %41 = arith.muli %20, %c8_i32_22 : i32
      %c1_i32 = arith.constant 1 : i32
      %42 = arith.addi %41, %c1_i32 : i32
      %43 = arith.index_cast %42 : i32 to index
      %c0_23 = arith.constant 0 : index
      %c0_24 = arith.constant 0 : index
      %44 = vector.load %arg5[%43, %c0_23, %c0_24] : memref<8x8x128xf32, #tpu.memory_space<vmem>>, vector<1x8x128xf32>
      %45 = vector.shape_cast %44 : vector<1x8x128xf32> to vector<8x128xf32>
      %46 = vector.broadcast %12 : vector<1x128xf32> to vector<8x128xf32>
      %47 = arith.subf %45, %46 : vector<8x128xf32>
      %48 = vector.broadcast %13 : vector<1x128xf32> to vector<8x128xf32>
      %49 = arith.mulf %47, %48 : vector<8x128xf32>
      %cst_25 = arith.constant 0.000000e+00 : f32
      %50 = vector.broadcast %cst_25 : f32 to vector<8x128xf32>
      %51 = arith.maximumf %49, %50 : vector<8x128xf32>
      %cst_26 = arith.constant 1.000000e+00 : f32
      %52 = vector.broadcast %cst_26 : f32 to vector<8x128xf32>
      %53 = arith.select %19, %52, %51 : vector<8x128xi1>, vector<8x128xf32>
      %54 = arith.mulf %53, %53 : vector<8x128xf32>
      %cst_27 = arith.constant dense<0.000000e+00> : vector<8x128xf32>
      %55 = tpu.matmul %54, %14, %cst_27 {dimension_numbers = #tpu.dot_dimension_numbers<[1], [0], [0], [1], [0, 0, 1, 1], [], []>} : vector<8x128xf32>, vector<128x128xf32>, vector<8x128xf32> -> vector<8x128xf32>
      %cst_28 = arith.constant 1.000000e-24 : f32
      %56 = vector.broadcast %cst_28 : f32 to vector<8x128xf32>
      %57 = arith.maximumf %55, %56 : vector<8x128xf32>
      %58 = math.rsqrt %57 : vector<8x128xf32>
      %59 = arith.mulf %53, %58 : vector<8x128xf32>
      %c8 = arith.constant 8 : index
      %c0_29 = arith.constant 0 : index
      %60 = vector.load %arg4[%c8, %c0_29] : memref<64x128xf32, #tpu.memory_space<vmem>>, vector<8x128xf32>
      tpu.vector_store %arg4[%c8, %c0_29], %59 {strides = array<i32>} : memref<64x128xf32, #tpu.memory_space<vmem>>, vector<8x128xf32>,
      %c8_i32_30 = arith.constant 8 : i32
      %61 = arith.muli %20, %c8_i32_30 : i32
      %c2_i32 = arith.constant 2 : i32
      %62 = arith.addi %61, %c2_i32 : i32
      %63 = arith.index_cast %62 : i32 to index
      %c0_31 = arith.constant 0 : index
      %c0_32 = arith.constant 0 : index
      %64 = vector.load %arg5[%63, %c0_31, %c0_32] : memref<8x8x128xf32, #tpu.memory_space<vmem>>, vector<1x8x128xf32>
      %65 = vector.shape_cast %64 : vector<1x8x128xf32> to vector<8x128xf32>
      %66 = vector.broadcast %12 : vector<1x128xf32> to vector<8x128xf32>
      %67 = arith.subf %65, %66 : vector<8x128xf32>
      %68 = vector.broadcast %13 : vector<1x128xf32> to vector<8x128xf32>
      %69 = arith.mulf %67, %68 : vector<8x128xf32>
      %cst_33 = arith.constant 0.000000e+00 : f32
      %70 = vector.broadcast %cst_33 : f32 to vector<8x128xf32>
      %71 = arith.maximumf %69, %70 : vector<8x128xf32>
      %cst_34 = arith.constant 1.000000e+00 : f32
      %72 = vector.broadcast %cst_34 : f32 to vector<8x128xf32>
      %73 = arith.select %19, %72, %71 : vector<8x128xi1>, vector<8x128xf32>
      %74 = arith.mulf %73, %73 : vector<8x128xf32>
      %cst_35 = arith.constant dense<0.000000e+00> : vector<8x128xf32>
      %75 = tpu.matmul %74, %14, %cst_35 {dimension_numbers = #tpu.dot_dimension_numbers<[1], [0], [0], [1], [0, 0, 1, 1], [], []>} : vector<8x128xf32>, vector<128x128xf32>, vector<8x128xf32> -> vector<8x128xf32>
      %cst_36 = arith.constant 1.000000e-24 : f32
      %76 = vector.broadcast %cst_36 : f32 to vector<8x128xf32>
      %77 = arith.maximumf %75, %76 : vector<8x128xf32>
      %78 = math.rsqrt %77 : vector<8x128xf32>
      %79 = arith.mulf %73, %78 : vector<8x128xf32>
      %c16 = arith.constant 16 : index
      %c0_37 = arith.constant 0 : index
      %80 = vector.load %arg4[%c16, %c0_37] : memref<64x128xf32, #tpu.memory_space<vmem>>, vector<8x128xf32>
      tpu.vector_store %arg4[%c16, %c0_37], %79 {strides = array<i32>} : memref<64x128xf32, #tpu.memory_space<vmem>>, vector<8x128xf32>,
      %c8_i32_38 = arith.constant 8 : i32
      %81 = arith.muli %20, %c8_i32_38 : i32
      %c3_i32 = arith.constant 3 : i32
      %82 = arith.addi %81, %c3_i32 : i32
      %83 = arith.index_cast %82 : i32 to index
      %c0_39 = arith.constant 0 : index
      %c0_40 = arith.constant 0 : index
      %84 = vector.load %arg5[%83, %c0_39, %c0_40] : memref<8x8x128xf32, #tpu.memory_space<vmem>>, vector<1x8x128xf32>
      %85 = vector.shape_cast %84 : vector<1x8x128xf32> to vector<8x128xf32>
      %86 = vector.broadcast %12 : vector<1x128xf32> to vector<8x128xf32>
      %87 = arith.subf %85, %86 : vector<8x128xf32>
      %88 = vector.broadcast %13 : vector<1x128xf32> to vector<8x128xf32>
      %89 = arith.mulf %87, %88 : vector<8x128xf32>
      %cst_41 = arith.constant 0.000000e+00 : f32
      %90 = vector.broadcast %cst_41 : f32 to vector<8x128xf32>
      %91 = arith.maximumf %89, %90 : vector<8x128xf32>
      %cst_42 = arith.constant 1.000000e+00 : f32
      %92 = vector.broadcast %cst_42 : f32 to vector<8x128xf32>
      %93 = arith.select %19, %92, %91 : vector<8x128xi1>, vector<8x128xf32>
      %94 = arith.mulf %93, %93 : vector<8x128xf32>
      %cst_43 = arith.constant dense<0.000000e+00> : vector<8x128xf32>
      %95 = tpu.matmul %94, %14, %cst_43 {dimension_numbers = #tpu.dot_dimension_numbers<[1], [0], [0], [1], [0, 0, 1, 1], [], []>} : vector<8x128xf32>, vector<128x128xf32>, vector<8x128xf32> -> vector<8x128xf32>
      %cst_44 = arith.constant 1.000000e-24 : f32
      %96 = vector.broadcast %cst_44 : f32 to vector<8x128xf32>
      %97 = arith.maximumf %95, %96 : vector<8x128xf32>
      %98 = math.rsqrt %97 : vector<8x128xf32>
      %99 = arith.mulf %93, %98 : vector<8x128xf32>
      %c24 = arith.constant 24 : index
      %c0_45 = arith.constant 0 : index
      %100 = vector.load %arg4[%c24, %c0_45] : memref<64x128xf32, #tpu.memory_space<vmem>>, vector<8x128xf32>
      tpu.vector_store %arg4[%c24, %c0_45], %99 {strides = array<i32>} : memref<64x128xf32, #tpu.memory_space<vmem>>, vector<8x128xf32>,
      %c8_i32_46 = arith.constant 8 : i32
      %101 = arith.muli %20, %c8_i32_46 : i32
      %c4_i32 = arith.constant 4 : i32
      %102 = arith.addi %101, %c4_i32 : i32
      %103 = arith.index_cast %102 : i32 to index
      %c0_47 = arith.constant 0 : index
      %c0_48 = arith.constant 0 : index
      %104 = vector.load %arg5[%103, %c0_47, %c0_48] : memref<8x8x128xf32, #tpu.memory_space<vmem>>, vector<1x8x128xf32>
      %105 = vector.shape_cast %104 : vector<1x8x128xf32> to vector<8x128xf32>
      %106 = vector.broadcast %12 : vector<1x128xf32> to vector<8x128xf32>
      %107 = arith.subf %105, %106 : vector<8x128xf32>
      %108 = vector.broadcast %13 : vector<1x128xf32> to vector<8x128xf32>
      %109 = arith.mulf %107, %108 : vector<8x128xf32>
      %cst_49 = arith.constant 0.000000e+00 : f32
      %110 = vector.broadcast %cst_49 : f32 to vector<8x128xf32>
      %111 = arith.maximumf %109, %110 : vector<8x128xf32>
      %cst_50 = arith.constant 1.000000e+00 : f32
      %112 = vector.broadcast %cst_50 : f32 to vector<8x128xf32>
      %113 = arith.select %19, %112, %111 : vector<8x128xi1>, vector<8x128xf32>
      %114 = arith.mulf %113, %113 : vector<8x128xf32>
      %cst_51 = arith.constant dense<0.000000e+00> : vector<8x128xf32>
      %115 = tpu.matmul %114, %14, %cst_51 {dimension_numbers = #tpu.dot_dimension_numbers<[1], [0], [0], [1], [0, 0, 1, 1], [], []>} : vector<8x128xf32>, vector<128x128xf32>, vector<8x128xf32> -> vector<8x128xf32>
      %cst_52 = arith.constant 1.000000e-24 : f32
      %116 = vector.broadcast %cst_52 : f32 to vector<8x128xf32>
      %117 = arith.maximumf %115, %116 : vector<8x128xf32>
      %118 = math.rsqrt %117 : vector<8x128xf32>
      %119 = arith.mulf %113, %118 : vector<8x128xf32>
      %c32 = arith.constant 32 : index
      %c0_53 = arith.constant 0 : index
      %120 = vector.load %arg4[%c32, %c0_53] : memref<64x128xf32, #tpu.memory_space<vmem>>, vector<8x128xf32>
      tpu.vector_store %arg4[%c32, %c0_53], %119 {strides = array<i32>} : memref<64x128xf32, #tpu.memory_space<vmem>>, vector<8x128xf32>,
      %c8_i32_54 = arith.constant 8 : i32
      %121 = arith.muli %20, %c8_i32_54 : i32
      %c5_i32 = arith.constant 5 : i32
      %122 = arith.addi %121, %c5_i32 : i32
      %123 = arith.index_cast %122 : i32 to index
      %c0_55 = arith.constant 0 : index
      %c0_56 = arith.constant 0 : index
      %124 = vector.load %arg5[%123, %c0_55, %c0_56] : memref<8x8x128xf32, #tpu.memory_space<vmem>>, vector<1x8x128xf32>
      %125 = vector.shape_cast %124 : vector<1x8x128xf32> to vector<8x128xf32>
      %126 = vector.broadcast %12 : vector<1x128xf32> to vector<8x128xf32>
      %127 = arith.subf %125, %126 : vector<8x128xf32>
      %128 = vector.broadcast %13 : vector<1x128xf32> to vector<8x128xf32>
      %129 = arith.mulf %127, %128 : vector<8x128xf32>
      %cst_57 = arith.constant 0.000000e+00 : f32
      %130 = vector.broadcast %cst_57 : f32 to vector<8x128xf32>
      %131 = arith.maximumf %129, %130 : vector<8x128xf32>
      %cst_58 = arith.constant 1.000000e+00 : f32
      %132 = vector.broadcast %cst_58 : f32 to vector<8x128xf32>
      %133 = arith.select %19, %132, %131 : vector<8x128xi1>, vector<8x128xf32>
      %134 = arith.mulf %133, %133 : vector<8x128xf32>
      %cst_59 = arith.constant dense<0.000000e+00> : vector<8x128xf32>
      %135 = tpu.matmul %134, %14, %cst_59 {dimension_numbers = #tpu.dot_dimension_numbers<[1], [0], [0], [1], [0, 0, 1, 1], [], []>} : vector<8x128xf32>, vector<128x128xf32>, vector<8x128xf32> -> vector<8x128xf32>
      %cst_60 = arith.constant 1.000000e-24 : f32
      %136 = vector.broadcast %cst_60 : f32 to vector<8x128xf32>
      %137 = arith.maximumf %135, %136 : vector<8x128xf32>
      %138 = math.rsqrt %137 : vector<8x128xf32>
      %139 = arith.mulf %133, %138 : vector<8x128xf32>
      %c40 = arith.constant 40 : index
      %c0_61 = arith.constant 0 : index
      %140 = vector.load %arg4[%c40, %c0_61] : memref<64x128xf32, #tpu.memory_space<vmem>>, vector<8x128xf32>
      tpu.vector_store %arg4[%c40, %c0_61], %139 {strides = array<i32>} : memref<64x128xf32, #tpu.memory_space<vmem>>, vector<8x128xf32>,
      %c8_i32_62 = arith.constant 8 : i32
      %141 = arith.muli %20, %c8_i32_62 : i32
      %c6_i32 = arith.constant 6 : i32
      %142 = arith.addi %141, %c6_i32 : i32
      %143 = arith.index_cast %142 : i32 to index
      %c0_63 = arith.constant 0 : index
      %c0_64 = arith.constant 0 : index
      %144 = vector.load %arg5[%143, %c0_63, %c0_64] : memref<8x8x128xf32, #tpu.memory_space<vmem>>, vector<1x8x128xf32>
      %145 = vector.shape_cast %144 : vector<1x8x128xf32> to vector<8x128xf32>
      %146 = vector.broadcast %12 : vector<1x128xf32> to vector<8x128xf32>
      %147 = arith.subf %145, %146 : vector<8x128xf32>
      %148 = vector.broadcast %13 : vector<1x128xf32> to vector<8x128xf32>
      %149 = arith.mulf %147, %148 : vector<8x128xf32>
      %cst_65 = arith.constant 0.000000e+00 : f32
      %150 = vector.broadcast %cst_65 : f32 to vector<8x128xf32>
      %151 = arith.maximumf %149, %150 : vector<8x128xf32>
      %cst_66 = arith.constant 1.000000e+00 : f32
      %152 = vector.broadcast %cst_66 : f32 to vector<8x128xf32>
      %153 = arith.select %19, %152, %151 : vector<8x128xi1>, vector<8x128xf32>
      %154 = arith.mulf %153, %153 : vector<8x128xf32>
      %cst_67 = arith.constant dense<0.000000e+00> : vector<8x128xf32>
      %155 = tpu.matmul %154, %14, %cst_67 {dimension_numbers = #tpu.dot_dimension_numbers<[1], [0], [0], [1], [0, 0, 1, 1], [], []>} : vector<8x128xf32>, vector<128x128xf32>, vector<8x128xf32> -> vector<8x128xf32>
      %cst_68 = arith.constant 1.000000e-24 : f32
      %156 = vector.broadcast %cst_68 : f32 to vector<8x128xf32>
      %157 = arith.maximumf %155, %156 : vector<8x128xf32>
      %158 = math.rsqrt %157 : vector<8x128xf32>
      %159 = arith.mulf %153, %158 : vector<8x128xf32>
      %c48 = arith.constant 48 : index
      %c0_69 = arith.constant 0 : index
      %160 = vector.load %arg4[%c48, %c0_69] : memref<64x128xf32, #tpu.memory_space<vmem>>, vector<8x128xf32>
      tpu.vector_store %arg4[%c48, %c0_69], %159 {strides = array<i32>} : memref<64x128xf32, #tpu.memory_space<vmem>>, vector<8x128xf32>,
      %c8_i32_70 = arith.constant 8 : i32
      %161 = arith.muli %20, %c8_i32_70 : i32
      %c7_i32_71 = arith.constant 7 : i32
      %162 = arith.addi %161, %c7_i32_71 : i32
      %163 = arith.index_cast %162 : i32 to index
      %c0_72 = arith.constant 0 : index
      %c0_73 = arith.constant 0 : index
      %164 = vector.load %arg5[%163, %c0_72, %c0_73] : memref<8x8x128xf32, #tpu.memory_space<vmem>>, vector<1x8x128xf32>
      %165 = vector.shape_cast %164 : vector<1x8x128xf32> to vector<8x128xf32>
      %166 = vector.broadcast %12 : vector<1x128xf32> to vector<8x128xf32>
      %167 = arith.subf %165, %166 : vector<8x128xf32>
      %168 = vector.broadcast %13 : vector<1x128xf32> to vector<8x128xf32>
      %169 = arith.mulf %167, %168 : vector<8x128xf32>
      %cst_74 = arith.constant 0.000000e+00 : f32
      %170 = vector.broadcast %cst_74 : f32 to vector<8x128xf32>
      %171 = arith.maximumf %169, %170 : vector<8x128xf32>
      %cst_75 = arith.constant 1.000000e+00 : f32
      %172 = vector.broadcast %cst_75 : f32 to vector<8x128xf32>
      %173 = arith.select %19, %172, %171 : vector<8x128xi1>, vector<8x128xf32>
      %174 = arith.mulf %173, %173 : vector<8x128xf32>
      %cst_76 = arith.constant dense<0.000000e+00> : vector<8x128xf32>
      %175 = tpu.matmul %174, %14, %cst_76 {dimension_numbers = #tpu.dot_dimension_numbers<[1], [0], [0], [1], [0, 0, 1, 1], [], []>} : vector<8x128xf32>, vector<128x128xf32>, vector<8x128xf32> -> vector<8x128xf32>
      %cst_77 = arith.constant 1.000000e-24 : f32
      %176 = vector.broadcast %cst_77 : f32 to vector<8x128xf32>
      %177 = arith.maximumf %175, %176 : vector<8x128xf32>
      %178 = math.rsqrt %177 : vector<8x128xf32>
      %179 = arith.mulf %173, %178 : vector<8x128xf32>
      %c56 = arith.constant 56 : index
      %c0_78 = arith.constant 0 : index
      %180 = vector.load %arg4[%c56, %c0_78] : memref<64x128xf32, #tpu.memory_space<vmem>>, vector<8x128xf32>
      tpu.vector_store %arg4[%c56, %c0_78], %179 {strides = array<i32>} : memref<64x128xf32, #tpu.memory_space<vmem>>, vector<8x128xf32>,
    } else {
    }
    return
  }
  func.func @transform_0(%arg0: i32) -> (i32, i32) {
    %c7_i32 = arith.constant 7 : i32
    %0 = arith.minsi %arg0, %c7_i32 : i32
    %c0_i32 = arith.constant 0 : i32
    %c0_i32_0 = arith.constant 0 : i32
    return %0, %c0_i32 : i32, i32
  }
  func.func @transform_1(%arg0: i32) -> (i32, i32) {
    %c0_i32 = arith.constant 0 : i32
    %c0_i32_0 = arith.constant 0 : i32
    %c0_i32_1 = arith.constant 0 : i32
    return %c0_i32, %c0_i32_0 : i32, i32
  }
  func.func @transform_2(%arg0: i32) -> (i32, i32) {
    %c0_i32 = arith.constant 0 : i32
    %c0_i32_0 = arith.constant 0 : i32
    %c0_i32_1 = arith.constant 0 : i32
    return %c0_i32, %c0_i32_0 : i32, i32
  }
  func.func @transform_3(%arg0: i32) -> (i32, i32) {
    %c8_i32 = arith.constant 8 : i32
    %0 = arith.subi %arg0, %c8_i32 : i32
    %c0_i32 = arith.constant 0 : i32
    %1 = arith.maxsi %0, %c0_i32 : i32
    %c0_i32_0 = arith.constant 0 : i32
    %c0_i32_1 = arith.constant 0 : i32
    return %1, %c0_i32_0 : i32, i32
  }
}

</mosaic_0001>

<bundles_post_ra>
// kernel: tpu_custom_call.1
= control target key start
LH: loop header
LB: loop body
LE: loop exit
PB: predicated region body
PF: predicated region fallthrough
CT: control target
= control target key end

     0   :  { %8 = vsyncpa [#allocation6], 0  ;;  %s3762_s0 = inlined_call_operand.hbm [shape: f32[64,1152], index: 0, kind: input, shape index: {}]   ;;  %s3763_s1 = inlined_call_operand.hbm [shape: bf16[1152,128], index: 1, kind: input, shape index: {}]   ;;  %s3764_s2 = inlined_call_operand.hbm [shape: f32[128,128], index: 2, kind: input, shape index: {}]   ;;  %s3765_s3 = inlined_call_operand.hbm [shape: f32[64,128], index: 3, kind: output, shape index: {}]  }
   0x1   :  { %10 = vsyncpa [#allocation6 + $0x1], 0 }
   0x2   :  { %11 = vsyncpa [#allocation9], 0 }
   0x3   :  { %12 = vsyncpa [#allocation7], 0 }
   0x4   :  { %14 = vsyncpa [#allocation7 + $0x1], 0  ;;  %s3221_s12 = smov 0   ;;  %s3223_s13 = smov 0  }
   0x5   :  { %s3225_s14 = smov 0   ;;  %s3227_s15 = smov 0  }
   0x6   :  { %s3229_s16 = smov 0   ;;  %s3231_s17 = smov 0  }
   0x7   :  { %s3233_s18 = smov 0  }
   0x8 LB: > { %s3255_s19 = sadd.s32 4294967295, %s3179_s18   ;;  %s1944_s20 = sadd.s32 4294967294, %s3179_s18   ;;  %s3179_s18 = sphi %s3233_s18, %s3793_s18   ;;  %s3175_s17 = sphi %s3231_s17, %s3792_s17   ;;  %s3171_s16 = sphi %s3229_s16, %s3791_s16   ;;  %s3167_s15 = sphi %s3227_s15, %s3790_s15   ;;  %s3163_s14 = sphi %s3225_s14, %s3789_s14   ;;  %s3159_s13 = sphi %s3223_s13, %s3788_s13   ;;  %s3155_s12 = sphi %s3221_s12, %s3787_s12  }
   0x9   : > { %p44_p0 = scmp.ne.s32.totalorder %s3171_s16, %s3167_s15  ;;  %p3766_p1 = scmp.eq.s32.totalorder %s3255_s19, 0 }
   0xa   : > { %p115_p2 = scmp.ne.s32.totalorder %s3163_s14, %s3159_s13  ;;  %p116_p4 = scmp.eq.s32.totalorder %s3255_s19, 8 }
   0xb   : > { %p3265_p3 = por %p3766_p1, %p44_p0  ;;  %p121_p5 = scmp.ne.s32.totalorder %s3159_s13, %s3155_s12 }
   0xc   : > { %p122_p6 = scmp.eq.s32.totalorder %s1944_s20, 8  ;;  %p3272_p7 = por %p116_p4, %p115_p2 }
   0xd   : > { %s3770_s22 = scalar_select %p3265_p3, 1, 0 }
   0xe   : > { %s3771_s23 = scalar_select %p3272_p7, 1, 0 }
   0xf   : > { %p1947_p8 = scmp.ge.s32.totalorder %s3179_s18, 1  ;;  %p3277_p9 = por %p122_p6, %p121_p5 }
  0x10   : > { %p129_p10 = scmp.lt.s32.totalorder %s3179_s18, 10  ;;  %s3181_s26 = smov [#allocation8]  }
  0x11   : > { %s3772_s24 = scalar_select %p3277_p9, 1, 0 }
  0x12   : > { %p3283_p12 = pnand %p1947_p8, %p129_p10  ;;  %s141_s27 = sshll.u32 %s3181_s26, 4  ;;  %s142_s27 = int_to_ptr.vmem [resolvable:$true] %s141_s27 }
  0x13   : > { %s3182_s29 = smov [#allocation10]   ;;  %s2999_s6 = scalar_lea.hbm %s3763_s1, 9216 }
  0x14   : > { %s3773_s25 = scalar_select %p3283_p12, 1, 0 }
  0x15   : > { %p2814_p13 = pneg %p3283_p12  ;;  %s154_s30 = sshll.u32 %s3182_s29, 4  ;;  %s3295_s30 = int_to_ptr.vmem [resolvable:$true] %s154_s30 }
  0x16   : > { %p3000_p2 = scmp.ne.s32.totalorder %s3763_s1, %s2999_s6  ;;  %p3006_p8 = scmp.lt.u32.totalorder %s2999_s6, %s3763_s1 }
  0x17   : > { %p3291_p0 = pnand %p2814_p13, %p3766_p1 }
  0x19   : > { %p3001_p4 = pneg %p3291_p0 }
  0x1b   : > { %p3002_p5 = pnand %p3001_p4, %p3000_p2 }
  0x1d   : > { %p3003_p6 = pneg %p3002_p5 }
  0x1f   : > { %p3008_p10 = pnand %p3006_p8, %p3003_p6 }
  0x21   : > { %3011 = shalt.err (!%p3008_p10)
}
  0x22   : > { %s3012_s11 = scalar_lea.vmem %s142_s27, 9216  ;;  %p3020_p9 = scmp.lt.s32.totalorder %s142_s27, %s142_s27 }
  0x23   : > { %p3013_p13 = scmp.ne.s32.totalorder %s142_s27, %s3012_s11  ;;  %p3021_p7 = scmp.lt.s32.totalorder %s3012_s11, %s3012_s11 }
  0x25   : > { %p3015_p11 = pnand %p3013_p13, %p3001_p4  ;;  %p3022_p3 = por %p3021_p7, %p3020_p9 }
  0x27   : > { %p3016_p1 = pneg %p3015_p11 }
  0x29   : > { %p3023_p12 = pnand %p3022_p3, %p3016_p1 }
  0x2b   : > { %3026 = shalt.err (!%p3023_p12)
}
  0x2c   : > { %s3183_s15 = smov 64   ;;  %s3184_s20 = smov 4  }
  0x2d   : > { %2817 = dma.hbm_to_vmem [thread:$0]  (!%p3291_p0), %s3763_s1, 9216, %s142_s27, [#allocation9], %s3183_s15, %s3183_s15, %s3184_s20  }
  0x2e   : > { %s3027_s6 = scalar_lea.hbm %s3764_s2, 2048 }
  0x2f   : > { %p3028_p11 = scmp.ne.s32.totalorder %s3764_s2, %s3027_s6  ;;  %p3034_p7 = scmp.lt.u32.totalorder %s3027_s6, %s3764_s2 }
  0x31   : > { %p3030_p1 = pnand %p3028_p11, %p3001_p4 }
  0x33   : > { %p3031_p3 = pneg %p3030_p1 }
  0x35   : > { %p3036_p9 = pnand %p3034_p7, %p3031_p3 }
  0x37   : > { %3039 = shalt.err (!%p3036_p9)
}
  0x38   : > { %s3040_s27 = scalar_lea.vmem %s3295_s30, 2048  ;;  %p3048_p6 = scmp.lt.s32.totalorder %s3295_s30, %s3295_s30 }
  0x39   : > { %p3041_p12 = scmp.ne.s32.totalorder %s3295_s30, %s3040_s27  ;;  %p3049_p8 = scmp.lt.s32.totalorder %s3040_s27, %s3040_s27 }
  0x3b   : > { %p3043_p2 = pnand %p3041_p12, %p3001_p4  ;;  %p3050_p10 = por %p3049_p8, %p3048_p6 }
  0x3d   : > { %p3044_p5 = pneg %p3043_p2 }
  0x3f   : > { %p3051_p13 = pnand %p3050_p10, %p3044_p5 }
  0x41   : > { %3054 = shalt.err (!%p3051_p13)
}
  0x42   : > { %s3185_s11 = smov 128   ;;  %s3186_s15 = smov 8  }
  0x43   : > { %2820 = dma.hbm_to_vmem [thread:$0]  (!%p3291_p0), %s3764_s2, 2048, %s3295_s30, [#allocation9], %s3185_s11, %s3185_s11, %s3186_s15  }
  0x44   : > { %s3345_s29 = sadd.s32 1, %s3179_s18   ;;  %p24_p4 = scmp.lt.s32.totalorder %s3179_s18, 7 }
  0x45   : > { %p26_p11 = scmp.lt.s32.totalorder %s3345_s29, 7  ;;  %s31_s4 = sadd.s32 1, %s3175_s17 }
  0x46   : > { %s25_s5 = scalar_select %p24_p4, %s3179_s18, 7 }
  0x47   : > { %s27_s6 = scalar_select %p26_p11, %s3345_s29, 7 }
  0x48   : > { %p38_p1 = scmp.ne.s32.totalorder %s3175_s17, %s3171_s16  ;;  %p39_p3 = scmp.eq.s32.totalorder %s3179_s18, 0 }
  0x49   : > { %s28_s28 = ssub.s32 %s25_s5, %s27_s6  ;;  %s1945_s7 = sadd.s32 4294967288, %s3179_s18 }
  0x4a   : > { %p29_p7 = scmp.eq.s32.totalorder %s28_s28, 0  ;;  %p3356_p9 = por %p39_p3, %p38_p1 }
  0x4b   : > { %p97_p0 = scmp.gt.s32.totalorder %s1945_s7, 0  ;;  %s1946_s30 = sadd.s32 4294967288, %s3345_s29 }
  0x4c   : > { %s3362_s9 = scalar_select %p29_p7, %s3175_s17, %s31_s4  }
  0x4d   : > { %s3795_s7 = smov (!%p97_p0, %s1945_s7), 0  ;;  %p100_p12 = scmp.gt.s32.totalorder %s1946_s30, 0 }
  0x4e   : > { %p2831_p2 = scmp.lt.s32.totalorder %s3179_s18, 9  ;;  %s168_s10 = sand.u32 1, %s3175_s17  }
  0x4f   : > { %s2800_s27 = smul.u32 1152, %s25_s5  ;;  %s3797_s30 = smov (!%p100_p12, %s1946_s30), 0 }
  0x50   : > { %s2799_s11 = smul.u32 72, %s168_s10  ;;  %s102_s15 = ssub.s32 %s3795_s7, %s3797_s30 }
  0x51   : > { %s3369_s6 = scalar_lea.hbm %s3762_s0, %s2800_s27  ;;  %p103_p5 = scmp.eq.s32.totalorder %s102_s15, 0 }
  0x52   : > { %s172_s4 = scalar_lea.vmem [#allocation5], %s2799_s11  ;;  %p3373_p6 = pnand %p2831_p2, %p3356_p9 }
  0x53   : > { %s182_s28 = sshll.u32 %s172_s4, 4  ;;  %s3777_s5 = sadd.s32 1, %s3163_s14  ;;  %s3382_s28 = int_to_ptr.vmem [resolvable:$true] %s182_s28 }
  0x54   : > { %s3380_s7 = scalar_select %p103_p5, %s3163_s14, %s3777_s5  }
  0x55   : > { %s169_s30 = scalar_lea.sflag [#allocation6], %s168_s10  ;;  %s3055_s27 = scalar_lea.hbm %s3369_s6, 1152 }
  0x56   : > { %p3056_p8 = scmp.ne.s32.totalorder %s3369_s6, %s3055_s27  ;;  %p3057_p10 = pneg %p3373_p6 }
  0x57   : > { %s3060_s15 = scalar_lea.hbm %s3762_s0, 9216  ;;  %p3061_p11 = scmp.lt.u32.totalorder %s3369_s6, %s3762_s0 }
  0x58   : > { %p3058_p13 = pnand %p3057_p10, %p3056_p8  ;;  %p3062_p1 = scmp.lt.u32.totalorder %s3060_s15, %s3055_s27 }
  0x59   : > { %p3064_p7 = scmp.lt.u32.totalorder %s3055_s27, %s3369_s6 }
  0x5a   : > { %p3059_p4 = pneg %p3058_p13  ;;  %p3063_p3 = por %p3062_p1, %p3061_p11 }
  0x5c   : > { %p3065_p9 = por %p3064_p7, %p3063_p3 }
  0x5e   : > { %p3066_p0 = pnand %p3065_p9, %p3059_p4 }
  0x60   : > { %3069 = shalt.err (!%p3066_p0)
}
  0x61   : > { %s3070_s10 = scalar_lea.vmem %s3382_s28, 1152  ;;  %s3187_s4 = smov [#allocation5]  }
  0x62   : > { %p3071_p12 = scmp.ne.s32.totalorder %s3382_s28, %s3070_s10  ;;  %s3075_s5 = sshll.u32 %s3187_s4, 4  ;;  %s3076_s5 = int_to_ptr.vmem [resolvable:$false] %s3075_s5 }
  0x63   : > { %s3077_s8 = scalar_lea.vmem %s3076_s5, 2304  ;;  %p3078_p8 = scmp.lt.s32.totalorder %s3382_s28, %s3076_s5 }
  0x64   : > { %p3073_p2 = pnand %p3071_p12, %p3057_p10  ;;  %p3079_p13 = scmp.lt.s32.totalorder %s3077_s8, %s3070_s10 }
  0x66   : > { %p3074_p5 = pneg %p3073_p2  ;;  %p3080_p11 = por %p3079_p13, %p3078_p8 }
  0x68   : > { %p3081_p1 = pnand %p3080_p11, %p3074_p5 }
  0x6a   : > { %3084 = shalt.err (!%p3081_p1)
}
  0x6b   : > { %2824 = dma.hbm_to_vmem [thread:$0]  (!%p3373_p6), %s3369_s6, 1152, %s3382_s28, %s169_s30  }
  0x6c   : > { %p3778_p4 = scmp.ne.s32.totalorder %s3773_s25, 0 }
  0x6d   : > { %s193_s27 = sand.u32 (!%p3778_p4), 1, %s3171_s16   ;;  %p3779_p10 = scmp.ne.s32.totalorder (!%p3778_p4), %s3770_s22, 0 }
  0x6e   : > { %191 = sbr.rel (%p3778_p4) target bundleno = 1345 (0x541), region = 32  ;;  %s194_s15 = scalar_lea.sflag (!%p3778_p4), [#allocation6], %s193_s27 }
  0x6f   : > { %s2801_s11 = smul.u32 (!%p3778_p4), 72, %s193_s27 }
  0x71   : > { %s3412_s20 = scalar_lea.vmem (!%p3778_p4), [#allocation5], %s2801_s11 }
  0x75   : > { %3142 = dma.done.wait (%p3779_p10), %s194_s15, 1152  }
  0x76   : > { %3144 = vsyncadd (%p3779_p10), %s194_s15, 4294966144  ;;  %p3780_p3 = scmp.eq.s32.totalorder %s3255_s19, 0 }
  0x78   : > { %3146 = dma.done.wait (%p3780_p3), [#allocation9], 11264   ;;  %p3781_p6 = pmov %p3780_p3 }
  0x79   : > { %s225_s21 = sand.u32 1, %s3159_s13   ;;  %p3782_p7 = scmp.ne.s32.totalorder %s3255_s19, 0 }
  0x7a   : > { %3148 = vsyncadd (%p3781_p6), [#allocation9], 4294956032  ;;  %s1955_s25 = sshll.u32 %s225_s21, 6  ;;  %v3188_v0 = vmov (!%p3782_p7), 0.0  }
  0x7b   : > { %s3425_s6 = scalar_lea.vmem [#allocation11], %s1955_s25  ;;  %238 = sbr.rel (%p3782_p7) target bundleno = 130 (0x82), region = 48  ;;  %239 = vst [vmem:[#allocation3] sm:$0x1] (!%p3782_p7), %v3188_v0  ;;  %240 = vst [vmem:[#allocation4] sm:$0x1] (!%p3782_p7), %v3188_v0 }
  0x82 PF: > { %p1957_p9 = scmp.ge.s32.totalorder %s3255_s19, 8 }
  0x83   : > { %v2909_v1 = vld [vmem:[#allocation8 + $0x40] sm:$0xff] (!%p1957_p9)   ;;  %v2913_v5 = vld [vmem:[#allocation8 + $0x48] sm:$0xff] (!%p1957_p9)   ;;  %v2917_v9 = vld [vmem:[#allocation8 + $0x50] sm:$0xff] (!%p1957_p9)   ;;  %vm3190_vm0 = vmmov (!%p1957_p9), 0   ;;  %s2030_s22 = sshll.u32 (!%p1957_p9), %s3255_s19, 3 }
  0x84   : > { %244 = sbr.rel (%p1957_p9) target bundleno = 460 (0x1cc), region = 52  ;;  %v2910_v2 = vld [vmem:[#allocation8 + $0xc0] sm:$0xff] (!%p1957_p9)   ;;  %2074 = vmatprep.subr.bf16.mxu0 (!%p1957_p9), %v2909_v1  ;;  %v2914_v6 = vld [vmem:[#allocation8 + $0xc8] sm:$0xff] (!%p1957_p9)   ;;  %v2918_v10 = vld [vmem:[#allocation8 + $0xd0] sm:$0xff] (!%p1957_p9)   ;;  %s1059_s28 = scalar_lea.vmem (!%p1957_p9), [#allocation2], %s2030_s22 }
  0x85   : > { %v2911_v3 = vld [vmem:[#allocation8] sm:$0xff] (!%p1957_p9)   ;;  %2096 = vmatprep.subr.bf16.mxu1 (!%p1957_p9), %v2910_v2  ;;  %v2915_v7 = vld [vmem:[#allocation8 + $0x8] sm:$0xff] (!%p1957_p9)   ;;  %v2919_v11 = vld [vmem:[#allocation8 + $0x10] sm:$0xff] (!%p1957_p9)  }
  0x86   : > { %v2912_v4 = vld [vmem:[#allocation8 + $0x80] sm:$0xff] (!%p1957_p9)   ;;  %2075 = vmatpush3.bf16.msra.mxu0 (!%p1957_p9), %v2911_v3  ;;  %v2916_v8 = vld [vmem:[#allocation8 + $0x88] sm:$0xff] (!%p1957_p9)   ;;  %v2920_v12 = vld [vmem:[#allocation8 + $0x90] sm:$0xff] (!%p1957_p9)  }
  0x87   : > { %2097 = vmatpush3.bf16.msra.mxu1 (!%p1957_p9), %v2912_v4  ;;  %2076 = vmatprep.subr.bf16.mxu0 (!%p1957_p9), %v2913_v5  ;;  %v2921_v13 = vld [vmem:[#allocation8 + $0x58] sm:$0xff] (!%p1957_p9)   ;;  %v2925_v17 = vld [vmem:[#allocation8 + $0x60] sm:$0xff] (!%p1957_p9)   ;;  %v2929_v21 = vld [vmem:[#allocation8 + $0x68] sm:$0xff] (!%p1957_p9)  }
  0x88   : > { %2098 = vmatprep.subr.bf16.mxu1 (!%p1957_p9), %v2914_v6  ;;  %v2922_v14 = vld [vmem:[#allocation8 + $0xd8] sm:$0xff] (!%p1957_p9)   ;;  %v2926_v18 = vld [vmem:[#allocation8 + $0xe0] sm:$0xff] (!%p1957_p9)   ;;  %v2930_v22 = vld [vmem:[#allocation8 + $0xe8] sm:$0xff] (!%p1957_p9)  }
  0x89   : > { %v2923_v15 = vld [vmem:[#allocation8 + $0x18] sm:$0xff] (!%p1957_p9)   ;;  %v2927_v19 = vld [vmem:[#allocation8 + $0x20] sm:$0xff] (!%p1957_p9)   ;;  %v2931_v23 = vld [vmem:[#allocation8 + $0x28] sm:$0xff] (!%p1957_p9)  }
  0x8a   : > { %2077 = vmatpush3.bf16.msra.mxu0 (!%p1957_p9), %v2915_v7  ;;  %v2924_v16 = vld [vmem:[#allocation8 + $0x98] sm:$0xff] (!%p1957_p9)   ;;  %v2928_v20 = vld [vmem:[#allocation8 + $0xa0] sm:$0xff] (!%p1957_p9)   ;;  %v2932_v24 = vld [vmem:[#allocation8 + $0xa8] sm:$0xff] (!%p1957_p9)  }
  0x8b   : > { %2099 = vmatpush3.bf16.msra.mxu1 %v2916_v8  ;;  %2078 = vmatprep.subr.bf16.mxu0 %v2917_v9  ;;  %v2933_v25 = vld [vmem:[#allocation8 + $0x70] sm:$0xff]   ;;  %v2937_v29 = vld [vmem:[#allocation8 + $0x78] sm:$0xff]   ;;  %v247_v39 = vld [vmem:[%s3412_s20 + $0x10] sm:$0xff] }
  0x8c   : > { %2100 = vmatprep.subr.bf16.mxu1 %v2918_v10  ;;  %v2934_v26 = vld [vmem:[#allocation8 + $0xf0] sm:$0xff]   ;;  %v2938_v30 = vld [vmem:[#allocation8 + $0xf8] sm:$0xff]   ;;  %v256_v40 = vpack.c.bf16 %v247_v39, %v247_v39  ;;  %v2941_v41 = vld [vmem:[#allocation8 + $0x140] sm:$0xff]  }
  0x8d   : > { %v2935_v27 = vld [vmem:[#allocation8 + $0x30] sm:$0xff]   ;;  %v2939_v31 = vld [vmem:[#allocation8 + $0x38] sm:$0xff]   ;;  %v2942_v42 = vld [vmem:[#allocation8 + $0x100] sm:$0xff]  }
  0x8e   : > { %2079 = vmatpush3.bf16.msra.mxu0 %v2919_v11  ;;  %v2936_v28 = vld [vmem:[#allocation8 + $0xb0] sm:$0xff]   ;;  %v2940_v32 = vld [vmem:[#allocation8 + $0xb8] sm:$0xff]   ;;  %v2943_v43 = vld [vmem:[#allocation8 + $0x1c0] sm:$0xff]  }
  0x8f   : > { %2101 = vmatpush3.bf16.msra.mxu1 %v2920_v12  ;;  %2080 = vmatprep.subr.bf16.mxu0 %v2921_v13  ;;  %v246_v33 = vld [vmem:[%s3412_s20 + $0x8] sm:$0xff]  ;;  %v248_v34 = vld [vmem:[%s3412_s20 + $0x18] sm:$0xff]  ;;  %v245_v35 = vld [vmem:[%s3412_s20] sm:$0xff] }
  0x90   : > { %2102 = vmatprep.subr.bf16.mxu1 %v2922_v14  ;;  %v255_v36 = vpack.c.bf16 %v246_v33, %v246_v33  ;;  %v257_v37 = vpack.c.bf16 %v248_v34, %v248_v34  ;;  %v254_v38 = vpack.c.bf16 %v245_v35, %v245_v35  ;;  %v2944_v44 = vld [vmem:[#allocation8 + $0x180] sm:$0xff]   ;;  %v2945_v45 = vld [vmem:[#allocation8 + $0x148] sm:$0xff]   ;;  %v2949_v49 = vld [vmem:[#allocation8 + $0x150] sm:$0xff]  }
  0x91   : > { %v2946_v46 = vld [vmem:[#allocation8 + $0x108] sm:$0xff]   ;;  %v2950_v50 = vld [vmem:[#allocation8 + $0x110] sm:$0xff]   ;;  %v2953_v53 = vld [vmem:[#allocation8 + $0x158] sm:$0xff]  }
  0x92   : > { %2081 = vmatpush3.bf16.msra.mxu0 %v2923_v15  ;;  %871 = vmatprep.mubr.bf16.mxu0 %v255_v36  ;;  %v2947_v47 = vld [vmem:[#allocation8 + $0x1c8] sm:$0xff]   ;;  %v2951_v51 = vld [vmem:[#allocation8 + $0x1d0] sm:$0xff]   ;;  %v2954_v54 = vld [vmem:[#allocation8 + $0x118] sm:$0xff]  }
  0x93   : > { %2103 = vmatpush3.bf16.msra.mxu1 %v2924_v16  ;;  %2082 = vmatprep.subr.bf16.mxu0 %v2925_v17  ;;  %v2948_v48 = vld [vmem:[#allocation8 + $0x188] sm:$0xff]   ;;  %v2952_v52 = vld [vmem:[#allocation8 + $0x190] sm:$0xff]   ;;  %v2955_v55 = vld [vmem:[#allocation8 + $0x1d8] sm:$0xff]   ;;  %v3189_v17 = vmov 0.0  }
  0x94   : > { %2104 = vmatprep.subr.bf16.mxu1 %v2926_v18  ;;  %911 = vmatprep.mubr.bf16.mxu1 %v257_v37  ;;  %v2956_v56 = vld [vmem:[#allocation8 + $0x198] sm:$0xff]   ;;  %v2957_v57 = vld [vmem:[#allocation8 + $0x160] sm:$0xff]   ;;  %v2961_v61 = vld [vmem:[#allocation8 + $0x168] sm:$0xff]  }
  0x95   : > { %v2958_v58 = vld [vmem:[#allocation8 + $0x120] sm:$0xff]   ;;  %v2962_v62 = vld [vmem:[#allocation8 + $0x128] sm:$0xff]   ;;  %v2965_v1 = vld [vmem:[#allocation8 + $0x170] sm:$0xff]  }
  0x96   : > { %2083 = vmatpush3.bf16.msra.mxu0 %v2927_v19  ;;  %v2959_v59 = vld [vmem:[#allocation8 + $0x1e0] sm:$0xff]   ;;  %v2963_v63 = vld [vmem:[#allocation8 + $0x1e8] sm:$0xff]   ;;  %v2966_v2 = vld [vmem:[#allocation8 + $0x130] sm:$0xff]  }
  0x97   : > { %2105 = vmatpush3.bf16.msra.mxu1 %v2928_v20  ;;  %2084 = vmatprep.subr.bf16.mxu0 %v2929_v21  ;;  %v2960_v60 = vld [vmem:[#allocation8 + $0x1a0] sm:$0xff]   ;;  %v2964_v0 = vld [vmem:[#allocation8 + $0x1a8] sm:$0xff]   ;;  %v2967_v3 = vld [vmem:[#allocation8 + $0x1f0] sm:$0xff]  }
  0x98   : > { %2106 = vmatprep.subr.bf16.mxu1 %v2930_v22  ;;  %v2968_v4 = vld [vmem:[#allocation8 + $0x1b0] sm:$0xff]   ;;  %v2969_v5 = vld [vmem:[#allocation8 + $0x178] sm:$0xff]   ;;  %v2973_v15 = vld [vmem:[#allocation8 + $0x200] sm:$0xff]  }
  0x99   : > { %v2970_v6 = vld [vmem:[#allocation8 + $0x138] sm:$0xff]   ;;  %v252_v13 = vld [vmem:[%s3412_s20 + $0x38] sm:$0xff]  ;;  %v251_v16 = vld [vmem:[%s3412_s20 + $0x30] sm:$0xff] }
  0x9a   : > { %2085 = vmatpush3.bf16.msra.mxu0 %v2931_v23  ;;  %v2971_v7 = vld [vmem:[#allocation8 + $0x1f8] sm:$0xff]   ;;  %v261_v14 = vpack.c.bf16 %v252_v13, %v252_v13  ;;  %v260_v18 = vpack.c.bf16 %v251_v16, %v251_v16  ;;  %v2974_v19 = vld [vmem:[#allocation8 + $0x208] sm:$0xff]   ;;  %v2975_v20 = vld [vmem:[#allocation8 + $0x210] sm:$0xff]  }
  0x9b   : > { %2107 = vmatpush3.bf16.msra.mxu1 %v2932_v24  ;;  %2086 = vmatprep.subr.bf16.mxu0 %v2933_v25  ;;  %v250_v8 = vld [vmem:[%s3412_s20 + $0x28] sm:$0xff]  ;;  %v249_v11 = vld [vmem:[%s3412_s20 + $0x20] sm:$0xff]  ;;  %v2978_v23 = vld [vmem:[#allocation8 + $0x228] sm:$0xff]  }
  0x9c   : > { %2108 = vmatprep.subr.bf16.mxu1 %v2934_v26  ;;  %v259_v9 = vpack.c.bf16 %v250_v8, %v250_v8  ;;  %v2972_v10 = vld [vmem:[#allocation8 + $0x1b8] sm:$0xff]   ;;  %v258_v12 = vpack.c.bf16 %v249_v11, %v249_v11  ;;  %v2977_v22 = vld [vmem:[#allocation8 + $0x220] sm:$0xff]   ;;  %v2979_v24 = vld [vmem:[#allocation8 + $0x230] sm:$0xff]  }
  0x9d   : > { %v2976_v21 = vld [vmem:[#allocation8 + $0x218] sm:$0xff]  }
  0x9e   : > { %2087 = vmatpush3.bf16.msra.mxu0 %v2935_v27  ;;  %v2980_v25 = vld [vmem:[#allocation8 + $0x238] sm:$0xff]  }
  0x9f   : > { %2109 = vmatpush3.bf16.msra.mxu1 %v2936_v28  ;;  %2088 = vmatprep.subr.bf16.mxu0 %v2937_v29  ;;  %v253_v26 = vld [vmem:[%s3412_s20 + $0x40] sm:$0xff] }
  0xa0   : > { %2110 = vmatprep.subr.bf16.mxu1 %v2938_v30  ;;  %v262_v27 = vpack.c.bf16 %v253_v26, %v253_v26 }
  0xa2   : > { %2089 = vmatpush3.bf16.msra.mxu0 %v2939_v31 }
  0xa3   : > { %2111 = vmatpush3.bf16.msra.mxu1 %v2940_v32  ;;  %2118 = vmatprep.subr.bf16.mxu0 %v2941_v41 }
  0xa4   : > { %2140 = vmatprep.subr.bf16.mxu1 %v2943_v43 }
  0xa5   : > { %872 = vmatmul.mubr.bf16.vlgmr.msra.gmra.mrb[0].mxu0 %v254_v38 }
  0xa6   : > { %912 = vmatmul.mubr.bf16.vlgmr.msra.gmra.mrb[0].mxu1 %v256_v40  ;;  %2119 = vmatpush3.bf16.msra.mxu0 %v2942_v42 }
  0xa7   : > { %2141 = vmatpush3.bf16.msra.mxu1 %v2944_v44  ;;  %2120 = vmatprep.subr.bf16.mxu0 %v2945_v45 }
  0xa8   : > { %2142 = vmatprep.subr.bf16.mxu1 %v2947_v47  ;;  %951 = vmatprep.mubr.bf16.mxu0 %v259_v9 }
  0xa9   : > { %991 = vmatprep.mubr.bf16.mxu1 %v261_v14 }
  0xaa   : > { %2121 = vmatpush3.bf16.msra.mxu0 %v2946_v46 }
  0xab   : > { %2143 = vmatpush3.bf16.msra.mxu1 %v2948_v48  ;;  %2122 = vmatprep.subr.bf16.mxu0 %v2949_v49 }
  0xac   : > { %2144 = vmatprep.subr.bf16.mxu1 %v2951_v51 }
  0xae   : > { %2123 = vmatpush3.bf16.msra.mxu0 %v2950_v50 }
  0xaf   : > { %2145 = vmatpush3.bf16.msra.mxu1 %v2952_v52  ;;  %2124 = vmatprep.subr.bf16.mxu0 %v2953_v53 }
  0xb0   : > { %2146 = vmatprep.subr.bf16.mxu1 %v2955_v55 }
  0xb2   : > { %2125 = vmatpush3.bf16.msra.mxu0 %v2954_v54 }
  0xb3   : > { %2147 = vmatpush3.bf16.msra.mxu1 %v2956_v56  ;;  %2126 = vmatprep.subr.bf16.mxu0 %v2957_v57 }
  0xb4   : > { %2148 = vmatprep.subr.bf16.mxu1 %v2959_v59 }
  0xb6   : > { %2127 = vmatpush3.bf16.msra.mxu0 %v2958_v58 }
  0xb7   : > { %2149 = vmatpush3.bf16.msra.mxu1 %v2960_v60  ;;  %2128 = vmatprep.subr.bf16.mxu0 %v2961_v61 }
  0xb8   : > { %2150 = vmatprep.subr.bf16.mxu1 %v2963_v63 }
  0xba   : > { %2129 = vmatpush3.bf16.msra.mxu0 %v2962_v62 }
  0xbb   : > { %2151 = vmatpush3.bf16.msra.mxu1 %v2964_v0  ;;  %2130 = vmatprep.subr.bf16.mxu0 %v2965_v1 }
  0xbc   : > { %2152 = vmatprep.subr.bf16.mxu1 %v2967_v3 }
  0xbe   : > { %2131 = vmatpush3.bf16.msra.mxu0 %v2966_v2  ;;  %v1039_v2 = vld [vmem:[#allocation3] sm:$0x1] }
  0xbf   : > { %2153 = vmatpush3.bf16.msra.mxu1 %v2968_v4  ;;  %2132 = vmatprep.subr.bf16.mxu0 %v2969_v5  ;;  %v1048_v5 = vld [vmem:[#allocation4] sm:$0x1] }
  0xc0   : > { %2154 = vmatprep.subr.bf16.mxu1 %v2971_v7 }
  0xc2   : > { %2133 = vmatpush3.bf16.msra.mxu0 %v2970_v6 }
  0xc3   : > { %2155 = vmatpush3.bf16.msra.mxu1 %v2972_v10  ;;  %2307 = vmatprep.subr.bf16.mxu0 %v3189_v17 }
  0xc5   : > { %952 = vmatmul.mubr.bf16.vlgmr.msra.gmra.mrb[4].mxu0 %v258_v12 }
  0xc6   : > { %2308 = vmatpush3.bf16.msra.mxu0 %v2973_v15  ;;  %992 = vmatmul.mubr.bf16.vlgmr.msra.gmra.mrb[4].mxu1 %v260_v18 }
  0xc7   : > { %2309 = vmatprep.subr.bf16.mxu0 %v3189_v17  ;;  %2323 = vmatprep.mubr.msk.bf16.mxu0 %vm3190_vm0, %v3189_v17 }
  0xca   : > { %2310 = vmatpush3.bf16.msra.mxu0 %v2974_v19 }
  0xcb   : > { %2311 = vmatprep.subr.bf16.mxu0 %v3189_v17 }
  0xce   : > { %2312 = vmatpush3.bf16.msra.mxu0 %v2975_v20 }
  0xcf   : > { %2313 = vmatprep.subr.bf16.mxu0 %v3189_v17 }
  0xd2   : > { %2314 = vmatpush3.bf16.msra.mxu0 %v2976_v21 }
  0xd3   : > { %2315 = vmatprep.subr.bf16.mxu0 %v3189_v17 }
  0xd6   : > { %2316 = vmatpush3.bf16.msra.mxu0 %v2977_v22 }
  0xd7   : > { %2317 = vmatprep.subr.bf16.mxu0 %v3189_v17 }
  0xda   : > { %2318 = vmatpush3.bf16.msra.mxu0 %v2978_v23 }
  0xdb   : > { %2319 = vmatprep.subr.bf16.mxu0 %v3189_v17 }
  0xde   : > { %2320 = vmatpush3.bf16.msra.mxu0 %v2979_v24 }
  0xdf   : > { %2321 = vmatprep.subr.bf16.mxu0 %v3189_v17 }
  0xe2   : > { %2322 = vmatpush3.bf16.msra.mxu0 %v2980_v25 }
  0xe5   : > { %2324 = vmatmul.mubr.bf16.vlgmr.msra.gmra.mrb[8].mxu0 %v262_v27 }
 0x178   : > { %v2090_v28 = vpop.f32.mrb[0].mxu0 }
 0x179   : > { %v2112_v29 = vpop.f32.mrb[0].mxu1  ;;  %v2091_v30 = vpop.f32.mrb[1].mxu0 }
 0x17a   : > { %v2113_v31 = vpop.f32.mrb[1].mxu1  ;;  %v2092_v32 = vadd.f32 %v2091_v30, %v2090_v28  ;;  %v2093_v34 = vpop.f32.mrb[2].mxu0 }
 0x17b   : > { %v2114_v33 = vadd.f32 %v2113_v31, %v2112_v29  ;;  %v2115_v35 = vpop.f32.mrb[2].mxu1  ;;  %v2094_v36 = vpop.f32.mrb[3].mxu0 }
 0x17c   : > { %v2116_v37 = vpop.f32.mrb[3].mxu1 }
 0x17d   : > { %v914_v38 = vadd.f32 %v2114_v33, %v2092_v32 }
 0x198   : > { %v2134_v39 = vpop.f32.mrb[4].mxu0 }
 0x199   : > { %v2135_v40 = vpop.f32.mrb[5].mxu0  ;;  %v2156_v41 = vpop.f32.mrb[4].mxu1 }
 0x19a   : > { %v2136_v42 = vadd.f32 %v2135_v40, %v2134_v39  ;;  %v2137_v43 = vpop.f32.mrb[6].mxu0  ;;  %v2157_v44 = vpop.f32.mrb[5].mxu1 }
 0x19b   : > { %v2138_v45 = vpop.f32.mrb[7].mxu0  ;;  %v2158_v46 = vadd.f32 %v2157_v44, %v2156_v41  ;;  %v2159_v47 = vpop.f32.mrb[6].mxu1 }
 0x19c   : > { %v954_v48 = vadd.f32 %v2136_v42, %v914_v38  ;;  %v2160_v49 = vpop.f32.mrb[7].mxu1 }
 0x19e   : > { %v994_v50 = vadd.f32 %v2158_v46, %v954_v48 }
 0x1b8   : > { %v1033_v51 = vpop.f32.mrb[8].mxu0 }
 0x1b9   : > { %v1034_v52 = vadd.f32 %v1033_v51, %v994_v50  ;;  %v2325_v53 = vpop.f32.mrb[9].mxu0 }
 0x1ba   : > { %v1036_v54 = vpop.f32.mrb[10].mxu0 }
 0x1bb   : > { %v1040_v55 = vrot.slane %v1034_v52, 4  ;;  %v1049_v56 = vmul.f32 %v1034_v52, %v1034_v52  ;;  %1060 = vst [vmem:[%s1059_s28] sm:$0xff] %v1034_v52  ;;  %v2326_v57 = vpop.f32.mrb[11].mxu0 }
 0x1bd   : > { %v1041_v58 = vadd.f32 %v1040_v55, %v1034_v52  ;;  %v1050_v59 = vrot.slane %v1049_v56, 4 }
 0x1bf   : > { %v1042_v60 = vrot.slane %v1041_v58, 2  ;;  %v1051_v61 = vadd.f32 %v1050_v59, %v1049_v56 }
 0x1c1   : > { %v1043_v62 = vadd.f32 %v1042_v60, %v1041_v58  ;;  %v1052_v63 = vrot.slane %v1051_v61, 2 }
 0x1c3   : > { %v1044_v0 = vrot.slane %v1043_v62, 1  ;;  %v1053_v1 = vadd.f32 %v1052_v63, %v1051_v61 }
 0x1c5   : > { %v1045_v3 = vadd.f32 %v1044_v0, %v1043_v62  ;;  %v1054_v4 = vrot.slane %v1053_v1, 1 }
 0x1c7   : > { %v1046_v6 = vadd.f32 %v1045_v3, %v1039_v2  ;;  %v1055_v7 = vadd.f32 %v1054_v4, %v1053_v1 }
 0x1c9   : > { %1047 = vst [vmem:[#allocation3] sm:$0x1] %v1046_v6  ;;  %v1056_v8 = vadd.f32 %v1055_v7, %v1048_v5 }
 0x1cb   : > { %1057 = vst [vmem:[#allocation4] sm:$0x1] %v1056_v8 }
 0x1cc PF: > { %p2031_p0 = scmp.ne.s32.totalorder %s3255_s19, 8 }
 0x1cd   : > { %s3191_s30 = smov (!%p2031_p0), 8   ;;  %s3192_s26 = smov (!%p2031_p0), 16  }
 0x1ce   : > { %1064 = sbr.rel (%p2031_p0) target bundleno = 957 (0x3bd), region = 56  ;;  %s3193_s10 = smov (!%p2031_p0), 32  }
 0x1cf   : > { %s3194_s4 = smov (!%p2031_p0), 64  }
 0x1d0   : > { %v1065_v9 = vld [vmem:[#allocation3] sm:$0x1] (!%p2031_p0) }
 0x1d1   : > { %1066 = vrot.lane.b32.xlu0 (!%p2031_p0), %v1065_v9, %s3191_s30 }
 0x1d2   : > { %v1078_v10 = vld [vmem:[#allocation4] sm:$0x1] (!%p2031_p0) }
 0x1d5   : > { %1079 = vrot.lane.b32.xlu0 %v1078_v10, %s3191_s30 }
 0x243   : > { %v1067_v11 = vpop.permute.xlu0 %1066 }
 0x244   : > { %v1068_v12 = vadd.f32 %v1067_v11, %v1065_v9 }
 0x246   : > { %1069 = vrot.lane.b32.xlu1 %v1068_v12, %s3192_s26 }
 0x247   : > { %v1080_v13 = vpop.permute.xlu0 %1079 }
 0x248   : > { %v1081_v14 = vadd.f32 %v1080_v13, %v1078_v10 }
 0x24a   : > { %1082 = vrot.lane.b32.xlu1 %v1081_v14, %s3192_s26 }
 0x2b8   : > { %v1070_v15 = vpop.permute.xlu1 %1069 }
 0x2b9   : > { %v1071_v16 = vadd.f32 %v1070_v15, %v1068_v12 }
 0x2bb   : > { %1072 = vrot.lane.b32.xlu0 %v1071_v16, %s3193_s10 }
 0x2bc   : > { %v1083_v17 = vpop.permute.xlu1 %1082 }
 0x2bd   : > { %v1084_v18 = vadd.f32 %v1083_v17, %v1081_v14 }
 0x2bf   : > { %1085 = vrot.lane.b32.xlu1 %v1084_v18, %s3193_s10 }
 0x32d   : > { %v1073_v19 = vpop.permute.xlu0 %1072 }
 0x32e   : > { %v1074_v20 = vadd.f32 %v1073_v19, %v1071_v16 }
 0x330   : > { %1075 = vrot.lane.b32.xlu0 %v1074_v20, %s3194_s4 }
 0x331   : > { %v1086_v21 = vpop.permute.xlu1 %1085 }
 0x332   : > { %v1087_v22 = vadd.f32 %v1086_v21, %v1084_v18 }
 0x334   : > { %1088 = vrot.lane.b32.xlu1 %v1087_v22, %s3194_s4 }
 0x3a2   : > { %v1076_v23 = vpop.permute.xlu0 %1075 }
 0x3a3   : > { %v1077_v24 = vadd.f32 %v1076_v23, %v1074_v20 }
 0x3a5   : > { %v1091_v25 = vmul.f32 0.0009765625, %v1077_v24 }
 0x3a6   : > { %v1089_v26 = vpop.permute.xlu1 %1088 }
 0x3a7   : > { %1096 = vst [vmem:[#allocation3] sm:$0x1] %v1091_v25  ;;  %v1090_v27 = vadd.f32 %v1089_v26, %v1087_v22  ;;  %v1093_v28 = vmul.f32 %v1091_v25, %v1091_v25 }
 0x3a9   : > { %v1092_v29 = vmul.f32 0.0009765625, %v1090_v27 }
 0x3ab   : > { %v1094_v30 = vsub.f32 %v1092_v29, %v1093_v28 }
 0x3ad   : > { %v1095_v31 = vmax.f32 %v1094_v30, 0.0 }
 0x3af   : > { %v1097_v32 = vadd.f32 1e-05, %v1095_v31 }
 0x3b1   : > { %2981 = vrsqrt.f32 %v1097_v32 }
 0x3bb   : > { %v2982_v33 = vpop.eup %2981 }
 0x3bc   : > { %1099 = vst [vmem:[#allocation4] sm:$0x1] %v2982_v33 }
 0x3bd PF: > { %p2032_p12 = scmp.lt.s32.totalorder %s3255_s19, 8 }
 0x3be   : > { %v1106_v34 = vld [vmem:[#allocation10] sm:$0xff] (!%p2032_p12)  ;;  %v1107_v35 = vld [vmem:[#allocation10 + $0x8] sm:$0xff] (!%p2032_p12)  ;;  %v1108_v36 = vld [vmem:[#allocation10 + $0x10] sm:$0xff] (!%p2032_p12)  ;;  %v3195_v37 = vmov (!%p2032_p12), 0.0|0.0   ;;  %s2033_s5 = sadd.s32 (!%p2032_p12), 4294967288, %s3255_s19  ;;  %vm3196_vm1 = vmmov (!%p2032_p12), 0   ;;  %v1122_v41 = vlaneseq (!%p2032_p12) }
 0x3bf   : > { %1103 = sbr.rel (%p2032_p12) target bundleno = 1317 (0x525), region = 60  ;;  %2607 = vmatprep.subr.bf16.mxu0 (!%p2032_p12), %v3195_v37  ;;  %2631 = vmatprep.subr.bf16.mxu1 (!%p2032_p12), %v3195_v37  ;;  %v3444_v38 = vpack.c.bf16 (!%p2032_p12), %v1107_v35, %v1106_v34  ;;  %v1109_v39 = vld [vmem:[#allocation10 + $0x18] sm:$0xff] (!%p2032_p12)  ;;  %v3197_v40 = vmov (!%p2032_p12), 0.0   ;;  %s2065_s8 = sshll.u32 (!%p2032_p12), %s2033_s5, 6  ;;  %v1110_v43 = vld [vmem:[#allocation10 + $0x20] sm:$0xff] (!%p2032_p12)  ;;  %v1111_v44 = vld [vmem:[#allocation10 + $0x28] sm:$0xff] (!%p2032_p12) }
 0x3c0   : > { %2359 = vmatprep.mubr.msk.f32.mxu0 (!%p2032_p12), %vm3196_vm1, %v3197_v40  ;;  %2394 = vmatprep.mubr.msk.f32.mxu1 (!%p2032_p12), %vm3196_vm1, %v3197_v40  ;;  %v3453_v42 = vpack.c.bf16 (!%p2032_p12), %v1109_v39, %v1108_v36  ;;  %v1112_v45 = vld [vmem:[#allocation10 + $0x30] sm:$0xff] (!%p2032_p12)  ;;  %v1123_v46 = vand.u32 (!%p2032_p12), 127, %v1122_v41  ;;  %v3459_v47 = vpack.c.bf16 (!%p2032_p12), %v1111_v44, %v1110_v43  ;;  %v3461_v48 = vld [vmem:[#allocation3] ss:$0 sm:$0xff] (!%p2032_p12)  ;;  %s3463_s27 = scalar_lea.vmem (!%p2032_p12), [#allocation2], %s2065_s8  ;;  %v1113_v51 = vld [vmem:[#allocation10 + $0x38] sm:$0xff] (!%p2032_p12) }
 0x3c1   : > { %2609 = vmatpush3.bf16.msra.mxu0 (!%p2032_p12), %v3444_v38  ;;  %2633 = vmatpush3.bf16.msra.mxu1 (!%p2032_p12), %v3444_v38  ;;  %v2049_v49 = vld [vmem:[%s3463_s27 + $0x20] sm:$0xff] (!%p2032_p12)  ;;  %v2052_v50 = vld [vmem:[%s3463_s27 + $0x28] sm:$0xff] (!%p2032_p12)  ;;  %v2055_v54 = vld [vmem:[%s3463_s27 + $0x30] sm:$0xff] (!%p2032_p12)  ;;  %v3481_v62 = vpack.c.bf16 (!%p2032_p12), %v1113_v51, %v1112_v45 }
 0x3c2   : > { %2610 = vmatprep.subr.bf16.mxu0 (!%p2032_p12), %v3195_v37  ;;  %2634 = vmatprep.subr.bf16.mxu1 (!%p2032_p12), %v3195_v37  ;;  %v1475_v52 = vsub.f32 (!%p2032_p12), %v2049_v49, %v3461_v48  ;;  %v1558_v53 = vsub.f32 (!%p2032_p12), %v2052_v50, %v3461_v48  ;;  %v2058_v55 = vld [vmem:[%s3463_s27 + $0x38] sm:$0xff] (!%p2032_p12)  ;;  %v1641_v57 = vsub.f32 (!%p2032_p12), %v2055_v54, %v3461_v48  ;;  %v1124_v58 = vand.u32 (!%p2032_p12), 7, %v1123_v46  ;;  %v1130_v1 = vld [vmem:[%s3463_s27] sm:$0xff] (!%p2032_p12)  ;;  %v2040_v3 = vld [vmem:[%s3463_s27 + $0x8] sm:$0xff] (!%p2032_p12) }
 0x3c3   : > { %v3473_v56 = vld [vmem:[#allocation4] ss:$0 sm:$0xff] (!%p2032_p12)  ;;  %v1724_v61 = vsub.f32 (!%p2032_p12), %v2058_v55, %v3461_v48  ;;  %v1114_v63 = vld [vmem:[#allocation10 + $0x40] sm:$0xff] (!%p2032_p12)  ;;  %v1137_v10 = vsub.f32 (!%p2032_p12), %v1130_v1, %v3461_v48  ;;  %v1226_v11 = vsub.f32 (!%p2032_p12), %v2040_v3, %v3461_v48  ;;  %v1116_v15 = vld [vmem:[#allocation10 + $0x50] sm:$0xff] (!%p2032_p12) }
 0x3c4   : > { %v1476_v59 = vmul.f32 (!%p2032_p12), %v3473_v56, %v1475_v52  ;;  %v1559_v60 = vmul.f32 (!%p2032_p12), %v3473_v56, %v1558_v53  ;;  %v1115_v0 = vld [vmem:[#allocation10 + $0x48] sm:$0xff] (!%p2032_p12)  ;;  %v1642_v2 = vmul.f32 (!%p2032_p12), %v3473_v56, %v1641_v57  ;;  %vm3491_vm2 = vcmp.eq.s32.totalorder (!%p2032_p12), %v1124_v58, 7  ;;  %v1117_v16 = vld [vmem:[#allocation10 + $0x58] sm:$0xff] (!%p2032_p12)  ;;  %v1118_v22 = vld [vmem:[#allocation10 + $0x60] sm:$0xff] (!%p2032_p12) }
 0x3c5   : > { %2612 = vmatpush3.bf16.msra.mxu0 (!%p2032_p12), %v3453_v42  ;;  %2636 = vmatpush3.bf16.msra.mxu1 (!%p2032_p12), %v3453_v42  ;;  %v1725_v6 = vmul.f32 (!%p2032_p12), %v3473_v56, %v1724_v61  ;;  %v3489_v8 = vpack.c.bf16 (!%p2032_p12), %v1115_v0, %v1114_v63  ;;  %v3519_v19 = vpack.c.bf16 (!%p2032_p12), %v1117_v16, %v1116_v15  ;;  %v1119_v23 = vld [vmem:[#allocation10 + $0x68] sm:$0xff] (!%p2032_p12)  ;;  %v1120_v27 = vld [vmem:[#allocation10 + $0x70] sm:$0xff] (!%p2032_p12)  ;;  %v1121_v28 = vld [vmem:[#allocation10 + $0x78] sm:$0xff] (!%p2032_p12) }
 0x3c6   : > { %2613 = vmatprep.subr.bf16.mxu0 %v3195_v37  ;;  %2637 = vmatprep.subr.bf16.mxu1 %v3195_v37  ;;  %v1477_v4 = vmax.f32 %v1476_v59, 0.0  ;;  %v1560_v5 = vmax.f32 %v1559_v60, 0.0  ;;  %v1643_v7 = vmax.f32 %v1642_v2, 0.0  ;;  %v1144_v20 = vmul.f32 %v3473_v56, %v1137_v10  ;;  %v2043_v34 = vld [vmem:[%s3463_s27 + $0x10] sm:$0xff]  ;;  %v2046_v35 = vld [vmem:[%s3463_s27 + $0x18] sm:$0xff] }
 0x3c7   : > { %v1726_v17 = vmax.f32 %v1725_v6, 0.0  ;;  %v1227_v21 = vmul.f32 %v3473_v56, %v1226_v11  ;;  %v3527_v24 = vpack.c.bf16 %v1119_v23, %v1118_v22  ;;  %v3533_v29 = vpack.c.bf16 %v1121_v28, %v1120_v27 }
 0x3c8   : > { %v3501_v12 = vsel %vm3491_vm2, 1.0, %v1477_v4  ;;  %v3505_v13 = vsel %vm3491_vm2, 1.0, %v1560_v5  ;;  %v3509_v14 = vsel %vm3491_vm2, 1.0, %v1643_v7  ;;  %v1145_v25 = vmax.f32 %v1144_v20, 0.0 }
 0x3c9   : > { %2615 = vmatpush3.bf16.msra.mxu0 %v3459_v47  ;;  %2639 = vmatpush3.bf16.msra.mxu1 %v3459_v47  ;;  %v3515_v18 = vsel %vm3491_vm2, 1.0, %v1726_v17  ;;  %v1228_v26 = vmax.f32 %v1227_v21, 0.0  ;;  %v1309_v36 = vsub.f32 %v2043_v34, %v3461_v48  ;;  %v1392_v39 = vsub.f32 %v2046_v35, %v3461_v48 }
 0x3ca   : > { %2616 = vmatprep.subr.bf16.mxu0 %v3195_v37  ;;  %2640 = vmatprep.subr.bf16.mxu1 %v3195_v37  ;;  %v3537_v30 = vsel %vm3491_vm2, 1.0, %v1145_v25  ;;  %v1479_v51 = vmul.f32 %v3501_v12, %v3501_v12  ;;  %v1562_v52 = vmul.f32 %v3505_v13, %v3505_v13 }
 0x3cb   : > { %v3541_v31 = vsel %vm3491_vm2, 1.0, %v1228_v26  ;;  %v1147_v32 = vmul.f32 %v3537_v30, %v3537_v30  ;;  %v1310_v41 = vmul.f32 %v3473_v56, %v1309_v36  ;;  %v1393_v43 = vmul.f32 %v3473_v56, %v1392_v39 }
 0x3cc   : > { %v1230_v33 = vmul.f32 %v3541_v31, %v3541_v31 }
 0x3cd   : > { %2618 = vmatpush3.bf16.msra.mxu0 %v3481_v62  ;;  %2642 = vmatpush3.bf16.msra.mxu1 %v3481_v62  ;;  %v1311_v44 = vmax.f32 %v1310_v41, 0.0  ;;  %v1394_v45 = vmax.f32 %v1393_v43, 0.0 }
 0x3ce   : > { %2619 = vmatprep.subr.bf16.mxu0 %v3195_v37  ;;  %2643 = vmatprep.subr.bf16.mxu1 %v3195_v37 }
 0x3cf   : > { %v3591_v46 = vsel %vm3491_vm2, 1.0, %v1311_v44  ;;  %v3595_v48 = vsel %vm3491_vm2, 1.0, %v1394_v45 }
 0x3d0   : > { %v1313_v49 = vmul.f32 %v3591_v46, %v3591_v46  ;;  %v1396_v50 = vmul.f32 %v3595_v48, %v3595_v48 }
 0x3d1   : > { %2621 = vmatpush3.bf16.msra.mxu0 %v3489_v8  ;;  %2645 = vmatpush3.bf16.msra.mxu1 %v3489_v8 }
 0x3d2   : > { %2622 = vmatprep.subr.bf16.mxu0 %v3195_v37  ;;  %2646 = vmatprep.subr.bf16.mxu1 %v3195_v37 }
 0x3d5   : > { %2624 = vmatpush3.bf16.msra.mxu0 %v3519_v19  ;;  %2648 = vmatpush3.bf16.msra.mxu1 %v3519_v19 }
 0x3d6   : > { %2625 = vmatprep.subr.bf16.mxu0 %v3195_v37  ;;  %2649 = vmatprep.subr.bf16.mxu1 %v3195_v37 }
 0x3d9   : > { %2627 = vmatpush3.bf16.msra.mxu0 %v3527_v24  ;;  %2651 = vmatpush3.bf16.msra.mxu1 %v3527_v24 }
 0x3da   : > { %2628 = vmatprep.subr.bf16.mxu0 %v3195_v37  ;;  %2652 = vmatprep.subr.bf16.mxu1 %v3195_v37 }
 0x3dd   : > { %2630 = vmatpush3.bf16.msra.mxu0 %v3533_v29  ;;  %2654 = vmatpush3.bf16.msra.mxu1 %v3533_v29 }
 0x3de   : > { %2655 = vmatprep.subr.bf16.mxu0 %v3195_v37  ;;  %2679 = vmatprep.subr.bf16.mxu1 %v3195_v37 }
 0x3e0   : > { %2360 = vmatmul.mubr.f32.vlgmr.msra.gmra.mrb[0].mxu0 %v1147_v32  ;;  %2395 = vmatmul.mubr.f32.vlgmr.msra.gmra.mrb[0].mxu1 %v1230_v33 }
 0x3e1   : > { %2657 = vmatpush3.bf16.msra.mxu0 %v3444_v38  ;;  %2681 = vmatpush3.bf16.msra.mxu1 %v3444_v38 }
 0x3e2   : > { %2658 = vmatprep.subr.bf16.mxu0 %v3195_v37  ;;  %2682 = vmatprep.subr.bf16.mxu1 %v3195_v37 }
 0x3e3   : > { %2429 = vmatprep.mubr.msk.f32.mxu0 %vm3196_vm1, %v3197_v40  ;;  %2464 = vmatprep.mubr.msk.f32.mxu1 %vm3196_vm1, %v3197_v40 }
 0x3e5   : > { %2660 = vmatpush3.bf16.msra.mxu0 %v3453_v42  ;;  %2684 = vmatpush3.bf16.msra.mxu1 %v3453_v42 }
 0x3e6   : > { %2661 = vmatprep.subr.bf16.mxu0 %v3195_v37  ;;  %2685 = vmatprep.subr.bf16.mxu1 %v3195_v37 }
 0x3e9   : > { %2663 = vmatpush3.bf16.msra.mxu0 %v3459_v47  ;;  %2687 = vmatpush3.bf16.msra.mxu1 %v3459_v47 }
 0x3ea   : > { %2664 = vmatprep.subr.bf16.mxu0 %v3195_v37  ;;  %2688 = vmatprep.subr.bf16.mxu1 %v3195_v37 }
 0x3ed   : > { %2666 = vmatpush3.bf16.msra.mxu0 %v3481_v62  ;;  %2690 = vmatpush3.bf16.msra.mxu1 %v3481_v62 }
 0x3ee   : > { %2667 = vmatprep.subr.bf16.mxu0 %v3195_v37  ;;  %2691 = vmatprep.subr.bf16.mxu1 %v3195_v37 }
 0x3f1   : > { %2669 = vmatpush3.bf16.msra.mxu0 %v3489_v8  ;;  %2693 = vmatpush3.bf16.msra.mxu1 %v3489_v8 }
 0x3f2   : > { %2670 = vmatprep.subr.bf16.mxu0 %v3195_v37  ;;  %2694 = vmatprep.subr.bf16.mxu1 %v3195_v37 }
 0x3f5   : > { %2672 = vmatpush3.bf16.msra.mxu0 %v3519_v19  ;;  %2696 = vmatpush3.bf16.msra.mxu1 %v3519_v19 }
 0x3f6   : > { %2673 = vmatprep.subr.bf16.mxu0 %v3195_v37  ;;  %2697 = vmatprep.subr.bf16.mxu1 %v3195_v37 }
 0x3f9   : > { %2675 = vmatpush3.bf16.msra.mxu0 %v3527_v24  ;;  %2699 = vmatpush3.bf16.msra.mxu1 %v3527_v24 }
 0x3fa   : > { %2676 = vmatprep.subr.bf16.mxu0 %v3195_v37  ;;  %2700 = vmatprep.subr.bf16.mxu1 %v3195_v37 }
 0x3fd   : > { %2678 = vmatpush3.bf16.msra.mxu0 %v3533_v29  ;;  %2702 = vmatpush3.bf16.msra.mxu1 %v3533_v29 }
 0x3fe   : > { %2703 = vmatprep.subr.bf16.mxu0 %v3195_v37  ;;  %2727 = vmatprep.subr.bf16.mxu1 %v3195_v37 }
 0x400   : > { %2430 = vmatmul.mubr.f32.vlgmr.msra.gmra.mrb[2].mxu0 %v1313_v49  ;;  %2465 = vmatmul.mubr.f32.vlgmr.msra.gmra.mrb[2].mxu1 %v1396_v50 }
 0x401   : > { %2705 = vmatpush3.bf16.msra.mxu0 %v3444_v38  ;;  %2729 = vmatpush3.bf16.msra.mxu1 %v3444_v38 }
 0x402   : > { %2706 = vmatprep.subr.bf16.mxu0 %v3195_v37  ;;  %2730 = vmatprep.subr.bf16.mxu1 %v3195_v37 }
 0x403   : > { %2499 = vmatprep.mubr.msk.f32.mxu0 %vm3196_vm1, %v3197_v40  ;;  %2534 = vmatprep.mubr.msk.f32.mxu1 %vm3196_vm1, %v3197_v40 }
 0x405   : > { %2708 = vmatpush3.bf16.msra.mxu0 %v3453_v42  ;;  %2732 = vmatpush3.bf16.msra.mxu1 %v3453_v42 }
 0x406   : > { %2709 = vmatprep.subr.bf16.mxu0 %v3195_v37  ;;  %2733 = vmatprep.subr.bf16.mxu1 %v3195_v37 }
 0x409   : > { %2711 = vmatpush3.bf16.msra.mxu0 %v3459_v47  ;;  %2735 = vmatpush3.bf16.msra.mxu1 %v3459_v47 }
 0x40a   : > { %2712 = vmatprep.subr.bf16.mxu0 %v3195_v37  ;;  %2736 = vmatprep.subr.bf16.mxu1 %v3195_v37 }
 0x40d   : > { %2714 = vmatpush3.bf16.msra.mxu0 %v3481_v62  ;;  %2738 = vmatpush3.bf16.msra.mxu1 %v3481_v62 }
 0x40e   : > { %2715 = vmatprep.subr.bf16.mxu0 %v3195_v37  ;;  %2739 = vmatprep.subr.bf16.mxu1 %v3195_v37 }
 0x411   : > { %2717 = vmatpush3.bf16.msra.mxu0 %v3489_v8  ;;  %2741 = vmatpush3.bf16.msra.mxu1 %v3489_v8 }
 0x412   : > { %2718 = vmatprep.subr.bf16.mxu0 %v3195_v37  ;;  %2742 = vmatprep.subr.bf16.mxu1 %v3195_v37 }
 0x415   : > { %2720 = vmatpush3.bf16.msra.mxu0 %v3519_v19  ;;  %2744 = vmatpush3.bf16.msra.mxu1 %v3519_v19 }
 0x416   : > { %2721 = vmatprep.subr.bf16.mxu0 %v3195_v37  ;;  %2745 = vmatprep.subr.bf16.mxu1 %v3195_v37 }
 0x419   : > { %2723 = vmatpush3.bf16.msra.mxu0 %v3527_v24  ;;  %2747 = vmatpush3.bf16.msra.mxu1 %v3527_v24 }
 0x41a   : > { %2724 = vmatprep.subr.bf16.mxu0 %v3195_v37  ;;  %2748 = vmatprep.subr.bf16.mxu1 %v3195_v37 }
 0x41d   : > { %2726 = vmatpush3.bf16.msra.mxu0 %v3533_v29  ;;  %2750 = vmatpush3.bf16.msra.mxu1 %v3533_v29 }
 0x41e   : > { %2751 = vmatprep.subr.bf16.mxu0 %v3195_v37  ;;  %2775 = vmatprep.subr.bf16.mxu1 %v3195_v37 }
 0x420   : > { %2500 = vmatmul.mubr.f32.vlgmr.msra.gmra.mrb[4].mxu0 %v1479_v51  ;;  %2535 = vmatmul.mubr.f32.vlgmr.msra.gmra.mrb[4].mxu1 %v1562_v52 }
 0x421   : > { %2753 = vmatpush3.bf16.msra.mxu0 %v3444_v38  ;;  %2777 = vmatpush3.bf16.msra.mxu1 %v3444_v38  ;;  %v1645_v38 = vmul.f32 %v3509_v14, %v3509_v14 }
 0x422   : > { %2754 = vmatprep.subr.bf16.mxu0 %v3195_v37  ;;  %2778 = vmatprep.subr.bf16.mxu1 %v3195_v37 }
 0x423   : > { %2569 = vmatprep.mubr.msk.f32.mxu0 %vm3196_vm1, %v3197_v40  ;;  %2604 = vmatprep.mubr.msk.f32.mxu1 %vm3196_vm1, %v3197_v40  ;;  %v1728_v40 = vmul.f32 %v3515_v18, %v3515_v18 }
 0x425   : > { %2756 = vmatpush3.bf16.msra.mxu0 %v3453_v42  ;;  %2780 = vmatpush3.bf16.msra.mxu1 %v3453_v42 }
 0x426   : > { %2757 = vmatprep.subr.bf16.mxu0 %v3195_v37  ;;  %2781 = vmatprep.subr.bf16.mxu1 %v3195_v37 }
 0x429   : > { %2759 = vmatpush3.bf16.msra.mxu0 %v3459_v47  ;;  %2783 = vmatpush3.bf16.msra.mxu1 %v3459_v47 }
 0x42a   : > { %2760 = vmatprep.subr.bf16.mxu0 %v3195_v37  ;;  %2784 = vmatprep.subr.bf16.mxu1 %v3195_v37 }
 0x42d   : > { %2762 = vmatpush3.bf16.msra.mxu0 %v3481_v62  ;;  %2786 = vmatpush3.bf16.msra.mxu1 %v3481_v62 }
 0x42e   : > { %2763 = vmatprep.subr.bf16.mxu0 %v3195_v37  ;;  %2787 = vmatprep.subr.bf16.mxu1 %v3195_v37 }
 0x431   : > { %2765 = vmatpush3.bf16.msra.mxu0 %v3489_v8  ;;  %2789 = vmatpush3.bf16.msra.mxu1 %v3489_v8 }
 0x432   : > { %2766 = vmatprep.subr.bf16.mxu0 %v3195_v37  ;;  %2790 = vmatprep.subr.bf16.mxu1 %v3195_v37 }
 0x435   : > { %2768 = vmatpush3.bf16.msra.mxu0 %v3519_v19  ;;  %2792 = vmatpush3.bf16.msra.mxu1 %v3519_v19 }
 0x436   : > { %2769 = vmatprep.subr.bf16.mxu0 %v3195_v37  ;;  %2793 = vmatprep.subr.bf16.mxu1 %v3195_v37 }
 0x439   : > { %2771 = vmatpush3.bf16.msra.mxu0 %v3527_v24  ;;  %2795 = vmatpush3.bf16.msra.mxu1 %v3527_v24 }
 0x43a   : > { %2772 = vmatprep.subr.bf16.mxu0 %v3195_v37  ;;  %2796 = vmatprep.subr.bf16.mxu1 %v3195_v37 }
 0x43d   : > { %2774 = vmatpush3.bf16.msra.mxu0 %v3533_v29  ;;  %2798 = vmatpush3.bf16.msra.mxu1 %v3533_v29 }
 0x440   : > { %2570 = vmatmul.mubr.f32.vlgmr.msra.gmra.mrb[6].mxu0 %v1645_v38  ;;  %2605 = vmatmul.mubr.f32.vlgmr.msra.gmra.mrb[6].mxu1 %v1728_v40 }
 0x4b3   : > { %v1214_v42 = vpop.f32.mrb[0].mxu0  ;;  %v1297_v47 = vpop.f32.mrb[0].mxu1 }
 0x4b4   : > { %v1218_v53 = vmax.f32 %v1214_v42, 1e-24  ;;  %v1301_v54 = vmax.f32 %v1297_v47, 1e-24  ;;  %v2361_v55 = vpop.f32.mrb[1].mxu0  ;;  %v2396_v37 = vpop.f32.mrb[1].mxu1 }
 0x4b6   : > { %2983 = vrsqrt.f32 %v1218_v53 }
 0x4b7   : > { %2985 = vrsqrt.f32 %v1301_v54 }
 0x4c0   : > { %v2984_v56 = vpop.eup %2983 }
 0x4c1   : > { %v2986_v57 = vpop.eup %2985  ;;  %v1220_v58 = vmul.f32 %v2984_v56, %v3537_v30 }
 0x4c2   : > { %v1303_v59 = vmul.f32 %v2986_v57, %v3541_v31 }
 0x4c3   : > { %1221 = vst [vmem:[%s3425_s6] sm:$0xff] %v1220_v58 }
 0x4c4   : > { %1304 = vst [vmem:[%s3425_s6 + $0x8] sm:$0xff] %v1303_v59 }
 0x4d3   : > { %v1380_v60 = vpop.f32.mrb[2].mxu0  ;;  %v1463_v61 = vpop.f32.mrb[2].mxu1 }
 0x4d4   : > { %v1384_v62 = vmax.f32 %v1380_v60, 1e-24  ;;  %v1467_v63 = vmax.f32 %v1463_v61, 1e-24  ;;  %v2431_v0 = vpop.f32.mrb[3].mxu0  ;;  %v2466_v1 = vpop.f32.mrb[3].mxu1 }
 0x4d6   : > { %2987 = vrsqrt.f32 %v1384_v62 }
 0x4d7   : > { %2989 = vrsqrt.f32 %v1467_v63 }
 0x4e0   : > { %v2988_v2 = vpop.eup %2987 }
 0x4e1   : > { %v2990_v3 = vpop.eup %2989  ;;  %v1386_v4 = vmul.f32 %v2988_v2, %v3591_v46 }
 0x4e2   : > { %v1469_v5 = vmul.f32 %v2990_v3, %v3595_v48 }
 0x4e3   : > { %1387 = vst [vmem:[%s3425_s6 + $0x10] sm:$0xff] %v1386_v4 }
 0x4e4   : > { %1470 = vst [vmem:[%s3425_s6 + $0x18] sm:$0xff] %v1469_v5 }
 0x4f3   : > { %v1546_v6 = vpop.f32.mrb[4].mxu0  ;;  %v1629_v7 = vpop.f32.mrb[4].mxu1 }
 0x4f4   : > { %v1550_v8 = vmax.f32 %v1546_v6, 1e-24  ;;  %v1633_v9 = vmax.f32 %v1629_v7, 1e-24  ;;  %v2501_v10 = vpop.f32.mrb[5].mxu0  ;;  %v2536_v11 = vpop.f32.mrb[5].mxu1 }
 0x4f6   : > { %2991 = vrsqrt.f32 %v1550_v8 }
 0x4f7   : > { %2993 = vrsqrt.f32 %v1633_v9 }
 0x500   : > { %v2992_v15 = vpop.eup %2991 }
 0x501   : > { %v2994_v16 = vpop.eup %2993  ;;  %v1552_v17 = vmul.f32 %v2992_v15, %v3501_v12 }
 0x502   : > { %v1635_v19 = vmul.f32 %v2994_v16, %v3505_v13 }
 0x503   : > { %1553 = vst [vmem:[%s3425_s6 + $0x20] sm:$0xff] %v1552_v17 }
 0x504   : > { %1636 = vst [vmem:[%s3425_s6 + $0x28] sm:$0xff] %v1635_v19 }
 0x513   : > { %v1712_v20 = vpop.f32.mrb[6].mxu0  ;;  %v1795_v21 = vpop.f32.mrb[6].mxu1 }
 0x514   : > { %v1716_v22 = vmax.f32 %v1712_v20, 1e-24  ;;  %v1799_v23 = vmax.f32 %v1795_v21, 1e-24  ;;  %v2571_v24 = vpop.f32.mrb[7].mxu0  ;;  %v2606_v25 = vpop.f32.mrb[7].mxu1 }
 0x516   : > { %2995 = vrsqrt.f32 %v1716_v22 }
 0x517   : > { %2997 = vrsqrt.f32 %v1799_v23 }
 0x520   : > { %v2996_v26 = vpop.eup %2995 }
 0x521   : > { %v2998_v27 = vpop.eup %2997  ;;  %v1718_v28 = vmul.f32 %v2996_v26, %v3509_v14 }
 0x522   : > { %v1801_v12 = vmul.f32 %v2998_v27, %v3515_v18 }
 0x523   : > { %1719 = vst [vmem:[%s3425_s6 + $0x30] sm:$0xff] %v1718_v28 }
 0x524   : > { %1802 = vst [vmem:[%s3425_s6 + $0x38] sm:$0xff] %v1801_v12 }
 0x525 PF: > { %s2060_s11 = sadd.s32 4294967288, %s3255_s19  ;;  %s1820_s15 = sshll.u32 %s3425_s6, 4  ;;  %s3703_s15 = int_to_ptr.vmem [resolvable:$true] %s1820_s15 }
 0x526   : > { %p1812_p2 = scmp.gt.s32.totalorder %s2060_s11, 0  ;;  %s3712_s30 = scalar_lea.sflag [#allocation7], %s225_s21 }
 0x527   : > { %s3085_s26 = scalar_lea.vmem %s3703_s15, 1024  ;;  %p3785_p8 = scmp.ne.s32.totalorder %s3771_s23, 0 }
 0x528   : > { %s3799_s11 = smov (!%p1812_p2, %s2060_s11), 0  ;;  %p3086_p5 = scmp.ne.s32.totalorder %s3703_s15, %s3085_s26 }
 0x529   : > { %s2073_s20 = sshll.u32 %s3799_s11, 10  ;;  %s3198_s19 = smov [#allocation11]  }
 0x52a   : > { %s3708_s28 = scalar_lea.hbm %s3765_s3, %s2073_s20  ;;  %p3087_p13 = pnand %p3086_p5, %p3785_p8 }
 0x52b   : > { %s3089_s6 = sshll.u32 %s3198_s19, 4  ;;  %s3090_s6 = int_to_ptr.vmem [resolvable:$false] %s3089_s6 }
 0x52c   : > { %p3088_p11 = pneg %p3087_p13  ;;  %s3091_s10 = scalar_lea.vmem %s3090_s6, 2048 }
 0x52d   : > { %p3092_p1 = scmp.lt.s32.totalorder %s3703_s15, %s3090_s6  ;;  %p3093_p4 = scmp.lt.s32.totalorder %s3091_s10, %s3085_s26 }
 0x52f   : > { %p3094_p10 = por %p3093_p4, %p3092_p1 }
 0x531   : > { %p3095_p3 = pnand %p3094_p10, %p3088_p11 }
 0x533   : > { %3098 = shalt.err (!%p3095_p3)
}
 0x534   : > { %s3099_s21 = scalar_lea.hbm %s3708_s28, 1024  ;;  %s3103_s8 = scalar_lea.hbm %s3765_s3, 1024 }
 0x535   : > { %p3100_p6 = scmp.ne.s32.totalorder %s3708_s28, %s3099_s21  ;;  %p3104_p0 = scmp.lt.u32.totalorder %s3708_s28, %s3765_s3 }
 0x536   : > { %p3105_p12 = scmp.lt.u32.totalorder %s3103_s8, %s3099_s21  ;;  %p3107_p5 = scmp.lt.u32.totalorder %s3099_s21, %s3708_s28 }
 0x537   : > { %p3101_p7 = pnand %p3100_p6, %p3785_p8 }
 0x538   : > { %p3106_p2 = por %p3105_p12, %p3104_p0 }
 0x539   : > { %p3102_p9 = pneg %p3101_p7 }
 0x53a   : > { %p3108_p13 = por %p3107_p5, %p3106_p2 }
 0x53c   : > { %p3109_p11 = pnand %p3108_p13, %p3102_p9 }
 0x53e   : > { %3112 = shalt.err (!%p3109_p11)
}
 0x53f   : > { %s3199_s20 = smov 128   ;;  %s3200_s25 = smov 8  }
 0x540   : > { %2812 = dma.vmem_to_hbm [thread:$0]  (%p3785_p8), %s3703_s15, 1024, %s3708_s28, %s3712_s30, %s3199_s20, %s3199_s20, %s3200_s25  }
 0x541 PF: > { %p2834_p1 = scmp.ge.s32.totalorder %s3179_s18, 2  ;;  %s1835_s22 = sand.u32 1, %s3155_s12  }
 0x542   : > { %p3786_p4 = scmp.ne.s32.totalorder %s3772_s24, 0  ;;  %s1836_s26 = scalar_lea.sflag [#allocation7], %s1835_s22 }
 0x544   : > { %p2826_p10 = pnand %p2834_p1, %p3786_p4 }
 0x546   : > { %3150 = dma.done.wait (!%p2826_p10), %s1836_s26, 1024  }
 0x547   : > { %3152 = vsyncadd (!%p2826_p10), %s1836_s26, 4294966272  ;;  %p17_p8 = scmp.ge.s32.totalorder %s3345_s29, 11   ;;  %s3787_s12 = smov %s3159_s13 }
 0x548   : > { %s3788_s13 = smov %s3163_s14  ;;  %s3789_s14 = smov %s3380_s7 }
 0x549   : > { %s3790_s15 = smov %s3171_s16  ;;  %s3791_s16 = smov %s3175_s17 }
 0x54a   : > { %s3792_s17 = smov %s3362_s9  ;;  %s3793_s18 = smov %s3345_s29 }
 0x54b   :  { %19 = sbr.rel (!%p17_p8) target bundleno = 8 (0x8), region = 110 }
 0x552   :  { %1841 = vsyncpa [#allocation6], 1 }
 0x553   :  { %1843 = vsyncpa [#allocation6 + $0x1], 1 }
 0x554   :  { %1844 = vsyncpa [#allocation9], 1 }
 0x555   :  { %1845 = vsyncpa [#allocation7], 1 }
 0x556   :  { %1847 = vsyncpa [#allocation7 + $0x1], 1 }

</bundles_post_ra>
